<compile_context>
chip_gen: v7x
topology: tpu7x:2x2x1
jax: 0.10.0
libtpu: 0.0.40
codegen_flags: <defaults>
</compile_context>

<pallas_src>
import jax
import jax.numpy as jnp
from jax.experimental import pallas as pl
from jax.experimental.pallas import tpu as pltpu

DIM = 40
INDIM = DIM + DIM // 2   # 60
MIDDIM = 128
OUTDIM = DIM             # 40
OUT_PAD = 128            # lane-dense padded output width (>= OUTDIM, mult of 128)


def _mlp_kernel(x_ref, w1_ref, b1_ref, w2_ref, b2_ref,
                w3_ref, b3_ref, w4_ref, b4_ref, o_ref):
    # bf16 MXU inputs, f32 accumulation, f32 bias-add/tanh.
    h = x_ref[...].astype(jnp.bfloat16)

    h = jnp.dot(h, w1_ref[...], preferred_element_type=jnp.float32) + b1_ref[...]
    h = jnp.tanh(h).astype(jnp.bfloat16)

    h = jnp.dot(h, w2_ref[...], preferred_element_type=jnp.float32) + b2_ref[...]
    h = jnp.tanh(h).astype(jnp.bfloat16)

    h = jnp.dot(h, w3_ref[...], preferred_element_type=jnp.float32) + b3_ref[...]
    h = jnp.tanh(h).astype(jnp.bfloat16)

    out = jnp.dot(h, w4_ref[...], preferred_element_type=jnp.float32) + b4_ref[...]
    o_ref[...] = out.astype(o_ref.dtype)


def init_params(key):
    """Deterministic init mimicking PyTorch nn.Linear default (U[-1/sqrt(fan_in), +])."""
    sizes = [(INDIM, MIDDIM), (MIDDIM, MIDDIM * 4),
             (MIDDIM * 4, MIDDIM * 2), (MIDDIM * 2, OUTDIM)]
    params = []
    for (fan_in, fan_out) in sizes:
        key, kw, kb = jax.random.split(key, 3)
        bound = 1.0 / jnp.sqrt(fan_in)
        w = jax.random.uniform(kw, (fan_in, fan_out), jnp.float32, -bound, bound)
        b = jax.random.uniform(kb, (1, fan_out), jnp.float32, -bound, bound)
        params.append((w, b))
    return params


def prepare_params(params):
    """Host-side prep: weights -> bf16, biases stay f32 (1, out),
    last layer zero-padded to OUT_PAD output lanes."""
    (w1, b1), (w2, b2), (w3, b3), (w4, b4) = params
    w4p = jnp.pad(w4, ((0, 0), (0, OUT_PAD - OUTDIM)))
    b4p = jnp.pad(b4, ((0, 0), (0, OUT_PAD - OUTDIM)))

    def cvt(w, b):
        return w.astype(jnp.bfloat16), b.astype(jnp.float32)

    return (cvt(w1, b1), cvt(w2, b2), cvt(w3, b3), cvt(w4p, b4p))


def generator_forward(x, prepared_params, *, block_batch=256):
    """x: (B, INDIM) float32 -> (B, OUTDIM) float32. Any batch size B >= 1."""
    (w1, b1), (w2, b2), (w3, b3), (w4, b4) = prepared_params
    B = x.shape[0]
    grid_b = pl.cdiv(B, block_batch)
    Bp = grid_b * block_batch
    if Bp != B:
        x = jnp.pad(x, ((0, Bp - B), (0, 0)))

    # Weight / bias blocks: constant block index -> resident in VMEM across grid.
    def wspec(shape):
        return pl.BlockSpec(shape, lambda i: (0, 0))

    flops_per_row = 2 * (INDIM * MIDDIM + MIDDIM * (MIDDIM * 4)
                         + (MIDDIM * 4) * (MIDDIM * 2) + (MIDDIM * 2) * OUT_PAD)
    trans_per_row = MIDDIM + MIDDIM * 4 + MIDDIM * 2
    bytes_weights = sum(int(a.size) * a.dtype.itemsize
                        for pair in prepared_params for a in pair)
    cost = pl.CostEstimate(
        flops=flops_per_row * Bp,
        transcendentals=trans_per_row * Bp,
        bytes_accessed=int(x.size) * 4 + Bp * OUT_PAD * 4 + bytes_weights,
    )

    out = pl.pallas_call(
        _mlp_kernel,
        out_shape=jax.ShapeDtypeStruct((Bp, OUT_PAD), jnp.float32),
        grid=(grid_b,),
        in_specs=[
            pl.BlockSpec((block_batch, INDIM), lambda i: (i, 0)),
            wspec(w1.shape), wspec(b1.shape),
            wspec(w2.shape), wspec(b2.shape),
            wspec(w3.shape), wspec(b3.shape),
            wspec(w4.shape), wspec(b4.shape),
        ],
        out_specs=pl.BlockSpec((block_batch, OUT_PAD), lambda i: (i, 0)),
        compiler_params=pltpu.CompilerParams(
            dimension_semantics=("parallel",)),
        cost_estimate=cost,
    )(x, w1, b1, w2, b2, w3, b3, w4, b4)

    return out[:B, :OUTDIM]


def reference_forward_f32(x, params):
    h = x
    for i, (w, b) in enumerate(params):
        h = h @ w + b
        if i < len(params) - 1:
            h = jnp.tanh(h)
    return h


def reference_forward_bf16(x, params):
    """Matches the kernel's numerics: bf16 matmul inputs, f32 accumulation."""
    h = x
    for i, (w, b) in enumerate(params):
        h = jnp.dot(h.astype(jnp.bfloat16), w.astype(jnp.bfloat16),
                    preferred_element_type=jnp.float32) + b
        if i < len(params) - 1:
            h = jnp.tanh(h)
    return h


if __name__ == "__main__":
    key = jax.random.PRNGKey(0)
    kp, kx = jax.random.split(key)
    params = init_params(kp)
    prepared = prepare_params(params)

    # Small primary test (batch < block_batch: single padded tile).
    batch = 8
    x = jax.random.normal(kx, (batch, INDIM), jnp.float32)
    out = jax.block_until_ready(generator_forward(x, prepared))
    assert out.shape == (batch, OUTDIM)

    ref_bf16 = reference_forward_bf16(x, params)
    err = jnp.max(jnp.abs(out - ref_bf16))
    assert jnp.allclose(out, ref_bf16, atol=5e-3, rtol=5e-3), f"max abs err {err}"

    ref_f32 = reference_forward_f32(x, params)
    err32 = jnp.max(jnp.abs(out - ref_f32))
    assert jnp.allclose(out, ref_f32, atol=1e-1, rtol=1e-1), f"max abs err vs f32 {err32}"

    # Tail / multi-grid-step check: batch not divisible by block_batch, 2 grid steps.
    batch2 = 260
    x2 = jax.random.normal(jax.random.PRNGKey(1), (batch2, INDIM), jnp.float32)
    out2 = jax.block_until_ready(generator_forward(x2, prepared))
    assert out2.shape == (batch2, OUTDIM)
    ref2 = reference_forward_bf16(x2, params)
    err2 = jnp.max(jnp.abs(out2 - ref2))
    assert jnp.allclose(out2, ref2, atol=5e-3, rtol=5e-3), f"max abs err {err2}"

    print("KERNEL_OK")
</pallas_src>

<mosaic_0001>
module attributes {stable_mosaic.version = 11 : i64} {
  func.func @_mlp_kernel(%arg0: i32, %arg1: memref<256x60xf32, #tpu.memory_space<vmem>>, %arg2: memref<60x128xbf16, #tpu.memory_space<vmem>>, %arg3: memref<1x128xf32, #tpu.memory_space<vmem>>, %arg4: memref<128x512xbf16, #tpu.memory_space<vmem>>, %arg5: memref<1x512xf32, #tpu.memory_space<vmem>>, %arg6: memref<512x256xbf16, #tpu.memory_space<vmem>>, %arg7: memref<1x256xf32, #tpu.memory_space<vmem>>, %arg8: memref<256x128xbf16, #tpu.memory_space<vmem>>, %arg9: memref<1x128xf32, #tpu.memory_space<vmem>>, %arg10: memref<256x128xf32, #tpu.memory_space<vmem>>) attributes {dimension_semantics = [#tpu.dimension_semantics<parallel>], iteration_bounds = array<i64: 1>, scalar_prefetch = 0 : i64, scratch_operands = 0 : i64, tpu.core_type = #tpu.core_type<tc>, window_params = [{transform_indices = @transform_0, window_bounds = array<i64: 256, 60>}, {pipeline_mode = #tpu.pipeline_mode<synchronous>, transform_indices = @transform_1, window_bounds = array<i64: 60, 128>}, {pipeline_mode = #tpu.pipeline_mode<synchronous>, transform_indices = @transform_2, window_bounds = array<i64: 1, 128>}, {pipeline_mode = #tpu.pipeline_mode<synchronous>, transform_indices = @transform_3, window_bounds = array<i64: 128, 512>}, {pipeline_mode = #tpu.pipeline_mode<synchronous>, transform_indices = @transform_4, window_bounds = array<i64: 1, 512>}, {pipeline_mode = #tpu.pipeline_mode<synchronous>, transform_indices = @transform_5, window_bounds = array<i64: 512, 256>}, {pipeline_mode = #tpu.pipeline_mode<synchronous>, transform_indices = @transform_6, window_bounds = array<i64: 1, 256>}, {pipeline_mode = #tpu.pipeline_mode<synchronous>, transform_indices = @transform_7, window_bounds = array<i64: 256, 128>}, {pipeline_mode = #tpu.pipeline_mode<synchronous>, transform_indices = @transform_8, window_bounds = array<i64: 1, 128>}, {transform_indices = @transform_9, window_bounds = array<i64: 256, 128>}]} {
    %c0 = arith.constant 0 : index
    %c0_0 = arith.constant 0 : index
    %0 = vector.load %arg1[%c0, %c0_0] : memref<256x60xf32, #tpu.memory_space<vmem>>, vector<256x60xf32>
    %1 = arith.truncf %0 : vector<256x60xf32> to vector<256x60xbf16>
    %c0_1 = arith.constant 0 : index
    %c0_2 = arith.constant 0 : index
    %2 = vector.load %arg2[%c0_1, %c0_2] : memref<60x128xbf16, #tpu.memory_space<vmem>>, vector<60x128xbf16>
    %cst = arith.constant dense<0.000000e+00> : vector<256x128xf32>
    %3 = tpu.matmul %1, %2, %cst {dimension_numbers = #tpu.dot_dimension_numbers<[1], [0], [0], [1], [0, 0, 1, 1], [], []>} : vector<256x60xbf16>, vector<60x128xbf16>, vector<256x128xf32> -> vector<256x128xf32>
    %c0_3 = arith.constant 0 : index
    %c0_4 = arith.constant 0 : index
    %4 = vector.load %arg3[%c0_3, %c0_4] : memref<1x128xf32, #tpu.memory_space<vmem>>, vector<1x128xf32>
    %5 = vector.broadcast %4 : vector<1x128xf32> to vector<256x128xf32>
    %6 = arith.addf %3, %5 : vector<256x128xf32>
    %7 = math.tanh %6 : vector<256x128xf32>
    %8 = arith.truncf %7 : vector<256x128xf32> to vector<256x128xbf16>
    %c0_5 = arith.constant 0 : index
    %c0_6 = arith.constant 0 : index
    %9 = vector.load %arg4[%c0_5, %c0_6] : memref<128x512xbf16, #tpu.memory_space<vmem>>, vector<128x512xbf16>
    %cst_7 = arith.constant dense<0.000000e+00> : vector<256x512xf32>
    %10 = tpu.matmul %8, %9, %cst_7 {dimension_numbers = #tpu.dot_dimension_numbers<[1], [0], [0], [1], [0, 0, 1, 1], [], []>} : vector<256x128xbf16>, vector<128x512xbf16>, vector<256x512xf32> -> vector<256x512xf32>
    %c0_8 = arith.constant 0 : index
    %c0_9 = arith.constant 0 : index
    %11 = vector.load %arg5[%c0_8, %c0_9] : memref<1x512xf32, #tpu.memory_space<vmem>>, vector<1x512xf32>
    %12 = vector.broadcast %11 : vector<1x512xf32> to vector<256x512xf32>
    %13 = arith.addf %10, %12 : vector<256x512xf32>
    %14 = math.tanh %13 : vector<256x512xf32>
    %15 = arith.truncf %14 : vector<256x512xf32> to vector<256x512xbf16>
    %c0_10 = arith.constant 0 : index
    %c0_11 = arith.constant 0 : index
    %16 = vector.load %arg6[%c0_10, %c0_11] : memref<512x256xbf16, #tpu.memory_space<vmem>>, vector<512x256xbf16>
    %cst_12 = arith.constant dense<0.000000e+00> : vector<256x256xf32>
    %17 = tpu.matmul %15, %16, %cst_12 {dimension_numbers = #tpu.dot_dimension_numbers<[1], [0], [0], [1], [0, 0, 1, 1], [], []>} : vector<256x512xbf16>, vector<512x256xbf16>, vector<256x256xf32> -> vector<256x256xf32>
    %c0_13 = arith.constant 0 : index
    %c0_14 = arith.constant 0 : index
    %18 = vector.load %arg7[%c0_13, %c0_14] : memref<1x256xf32, #tpu.memory_space<vmem>>, vector<1x256xf32>
    %19 = vector.broadcast %18 : vector<1x256xf32> to vector<256x256xf32>
    %20 = arith.addf %17, %19 : vector<256x256xf32>
    %21 = math.tanh %20 : vector<256x256xf32>
    %22 = arith.truncf %21 : vector<256x256xf32> to vector<256x256xbf16>
    %c0_15 = arith.constant 0 : index
    %c0_16 = arith.constant 0 : index
    %23 = vector.load %arg8[%c0_15, %c0_16] : memref<256x128xbf16, #tpu.memory_space<vmem>>, vector<256x128xbf16>
    %cst_17 = arith.constant dense<0.000000e+00> : vector<256x128xf32>
    %24 = tpu.matmul %22, %23, %cst_17 {dimension_numbers = #tpu.dot_dimension_numbers<[1], [0], [0], [1], [0, 0, 1, 1], [], []>} : vector<256x256xbf16>, vector<256x128xbf16>, vector<256x128xf32> -> vector<256x128xf32>
    %c0_18 = arith.constant 0 : index
    %c0_19 = arith.constant 0 : index
    %25 = vector.load %arg9[%c0_18, %c0_19] : memref<1x128xf32, #tpu.memory_space<vmem>>, vector<1x128xf32>
    %26 = vector.broadcast %25 : vector<1x128xf32> to vector<256x128xf32>
    %27 = arith.addf %24, %26 : vector<256x128xf32>
    %c0_20 = arith.constant 0 : index
    %c0_21 = arith.constant 0 : index
    %28 = vector.load %arg10[%c0_20, %c0_21] : memref<256x128xf32, #tpu.memory_space<vmem>>, vector<256x128xf32>
    tpu.vector_store %arg10[%c0_20, %c0_21], %27 {strides = array<i32>} : memref<256x128xf32, #tpu.memory_space<vmem>>, vector<256x128xf32>,
    return
  }
  func.func @transform_0(%arg0: i32) -> (i32, i32) {
    %c0_i32 = arith.constant 0 : i32
    %c0_i32_0 = arith.constant 0 : i32
    return %arg0, %c0_i32 : i32, i32
  }
  func.func @transform_1(%arg0: i32) -> (i32, i32) {
    %c0_i32 = arith.constant 0 : i32
    %c0_i32_0 = arith.constant 0 : i32
    %c0_i32_1 = arith.constant 0 : i32
    return %c0_i32, %c0_i32_0 : i32, i32
  }
  func.func @transform_2(%arg0: i32) -> (i32, i32) {
    %c0_i32 = arith.constant 0 : i32
    %c0_i32_0 = arith.constant 0 : i32
    %c0_i32_1 = arith.constant 0 : i32
    return %c0_i32, %c0_i32_0 : i32, i32
  }
  func.func @transform_3(%arg0: i32) -> (i32, i32) {
    %c0_i32 = arith.constant 0 : i32
    %c0_i32_0 = arith.constant 0 : i32
    %c0_i32_1 = arith.constant 0 : i32
    return %c0_i32, %c0_i32_0 : i32, i32
  }
  func.func @transform_4(%arg0: i32) -> (i32, i32) {
    %c0_i32 = arith.constant 0 : i32
    %c0_i32_0 = arith.constant 0 : i32
    %c0_i32_1 = arith.constant 0 : i32
    return %c0_i32, %c0_i32_0 : i32, i32
  }
  func.func @transform_5(%arg0: i32) -> (i32, i32) {
    %c0_i32 = arith.constant 0 : i32
    %c0_i32_0 = arith.constant 0 : i32
    %c0_i32_1 = arith.constant 0 : i32
    return %c0_i32, %c0_i32_0 : i32, i32
  }
  func.func @transform_6(%arg0: i32) -> (i32, i32) {
    %c0_i32 = arith.constant 0 : i32
    %c0_i32_0 = arith.constant 0 : i32
    %c0_i32_1 = arith.constant 0 : i32
    return %c0_i32, %c0_i32_0 : i32, i32
  }
  func.func @transform_7(%arg0: i32) -> (i32, i32) {
    %c0_i32 = arith.constant 0 : i32
    %c0_i32_0 = arith.constant 0 : i32
    %c0_i32_1 = arith.constant 0 : i32
    return %c0_i32, %c0_i32_0 : i32, i32
  }
  func.func @transform_8(%arg0: i32) -> (i32, i32) {
    %c0_i32 = arith.constant 0 : i32
    %c0_i32_0 = arith.constant 0 : i32
    %c0_i32_1 = arith.constant 0 : i32
    return %c0_i32, %c0_i32_0 : i32, i32
  }
  func.func @transform_9(%arg0: i32) -> (i32, i32) {
    %c0_i32 = arith.constant 0 : i32
    %c0_i32_0 = arith.constant 0 : i32
    return %arg0, %c0_i32 : i32, i32
  }
}

</mosaic_0001>

<bundles_post_ra>
// kernel: tpu_custom_call.1
= control target key start
LH: loop header
LB: loop body
LE: loop exit
PB: predicated region body
PF: predicated region fallthrough
CT: control target
= control target key end

     0   :  { %14 = vsyncpa [#allocation3], 0  ;;  %s4739_s0 = inlined_call_operand.vmem [shape: f32[256,60], index: 0, kind: input, shape index: {}]   ;;  %s4740_s1 = inlined_call_operand.hbm [shape: bf16[60,128], index: 1, kind: input, shape index: {}]   ;;  %s4741_s2 = inlined_call_operand.vmem [shape: f32[1,128], index: 2, kind: input, shape index: {}]   ;;  %s4742_s3 = inlined_call_operand.vmem [shape: bf16[128,512], index: 3, kind: input, shape index: {}]   ;;  %s4743_s4 = inlined_call_operand.vmem [shape: f32[1,512], index: 4, kind: input, shape index: {}]   ;;  %s4744_s5 = inlined_call_operand.hbm [shape: bf16[512,256], index: 5, kind: input, shape index: {}]   ;;  %s4745_s6 = inlined_call_operand.vmem [shape: f32[1,256], index: 6, kind: input, shape index: {}]   ;;  %s4746_s7 = inlined_call_operand.vmem [shape: bf16[256,128], index: 7, kind: input, shape index: {}]   ;;  %s4747_s8 = inlined_call_operand.vmem [shape: f32[1,128], index: 8, kind: input, shape index: {}]   ;;  %s4748_s9 = inlined_call_operand.hbm [shape: f32[256,128], index: 9, kind: output, shape index: {}]  }
   0x1   :  { %15 = vsyncpa [#allocation6], 0 }
   0x2   :  { %16 = vsyncpa [#allocation4], 0  ;;  %s3569_s30 = smov [#allocation2]   ;;  %s3497_s13 = scalar_lea.hbm %s4740_s1, 512 }
   0x3   :  { %s24_s10 = sshll.u32 %s3569_s30, 4  ;;  %p3498_p0 = scmp.ne.s32.totalorder %s4740_s1, %s3497_s13  ;;  %s25_s10 = int_to_ptr.vmem [resolvable:$true] %s24_s10 }
   0x4   :  { %p3501_p1 = scmp.lt.u32.totalorder %s3497_s13, %s4740_s1 }
   0x6   :  { %p3503_p2 = pnand %p3501_p1, %p3498_p0 }
   0x8   :  { %3506 = shalt.err (!%p3503_p2)
}
   0x9   :  { %s3507_s18 = scalar_lea.vmem %s25_s10, 512  ;;  %p3512_p4 = scmp.lt.s32.totalorder %s25_s10, %s25_s10 }
   0xa   :  { %p3508_p3 = scmp.ne.s32.totalorder %s25_s10, %s3507_s18  ;;  %p3513_p5 = scmp.lt.s32.totalorder %s3507_s18, %s3507_s18 }
   0xc   :  { %p3514_p6 = por %p3513_p5, %p3512_p4 }
   0xe   :  { %p3515_p7 = pnand %p3514_p6, %p3508_p3 }
  0x10   :  { %3518 = shalt.err (!%p3515_p7)
}
  0x11   :  { %s3570_s19 = smov 64   ;;  %s3571_s20 = smov 4  }
  0x12   :  { %30 = dma.hbm_to_vmem [thread:$0]  %s4740_s1, 512, %s25_s10, [#allocation3], %s3570_s19, %s3570_s19, %s3571_s20  }
  0x13   :  { %s3572_s23 = smov [#allocation5]   ;;  %s3519_s27 = scalar_lea.hbm %s4744_s5, 8192 }
  0x14   :  { %s42_s24 = sshll.u32 %s3572_s23, 4  ;;  %p3520_p8 = scmp.ne.s32.totalorder %s4744_s5, %s3519_s27  ;;  %s43_s24 = int_to_ptr.vmem [resolvable:$true] %s42_s24 }
  0x15   :  { %p3523_p9 = scmp.lt.u32.totalorder %s3519_s27, %s4744_s5 }
  0x17   :  { %p3525_p10 = pnand %p3523_p9, %p3520_p8 }
  0x19   :  { %3528 = shalt.err (!%p3525_p10)
}
  0x1a   :  { %s3529_s12 = scalar_lea.vmem %s43_s24, 8192  ;;  %p3534_p12 = scmp.lt.s32.totalorder %s43_s24, %s43_s24 }
  0x1b   :  { %p3530_p11 = scmp.ne.s32.totalorder %s43_s24, %s3529_s12  ;;  %p3535_p13 = scmp.lt.s32.totalorder %s3529_s12, %s3529_s12 }
  0x1d   :  { %p3536_p0 = por %p3535_p13, %p3534_p12 }
  0x1f   :  { %p3537_p1 = pnand %p3536_p0, %p3530_p11 }
  0x21   :  { %3540 = shalt.err (!%p3537_p1)
}
  0x22   :  { %s3573_s1 = smov 128   ;;  %s3574_s10 = smov 8  }
  0x23   :  { %48 = dma.hbm_to_vmem [thread:$0]  %s4744_s5, 8192, %s43_s24, [#allocation6], %s3573_s1, %s3573_s1, %s3574_s10  }
  0x24   :  { %3563 = dma.done.wait [#allocation3], 512  }
  0x25   :  { %3564 = vsyncadd [#allocation3], 4294966784 }
  0x26   :  { %3565 = dma.done.wait [#allocation6], 8192  }
  0x27   :  { %3566 = vsyncadd [#allocation6], 4294959104  ;;  %v2885_v0 = vld [vmem:[#allocation2] sm:$0xff]   ;;  %v2886_v1 = vld [vmem:[#allocation2 + $0x8] sm:$0xff]   ;;  %vm148_vm0 = vcmask 490496   ;;  %vm197_vm1 = vcmask 1045504  }
  0x28   :  { %2692 = vmatprep.subr.bf16.mxu0 %v2885_v0  ;;  %v2887_v2 = vld [vmem:[#allocation2 + $0x10] sm:$0xff]   ;;  %v62_v3 = vld [vmem:[%s4739_s0] sm:$0xff]  ;;  %v63_v4 = vld [vmem:[%s4739_s0 + $0x8] sm:$0xff] }
  0x29   :  { %2693 = vmatpush3.bf16.msra.mxu0 %v2885_v0  ;;  %v94_v5 = vpack.c.bf16 %v63_v4, %v62_v3  ;;  %v2888_v6 = vld [vmem:[#allocation2 + $0x18] sm:$0x3f]   ;;  %v64_v7 = vld [vmem:[%s4739_s0 + $0x10] sm:$0xff]  ;;  %v66_v10 = vld [vmem:[%s4739_s0 + $0x20] sm:$0xff] }
  0x2a   :  { %2694 = vmatprep.subr.bf16.mxu0 %v2886_v1  ;;  %v65_v8 = vld [vmem:[%s4739_s0 + $0x18] sm:$0xff]  ;;  %v199_v9 = vsel %vm197_vm1, %v2888_v6, 0  ;;  %v67_v11 = vld [vmem:[%s4739_s0 + $0x28] sm:$0xff]  ;;  %v2889_v14 = vld [vmem:[%s4742_s3] ss:$16 sps:$4 sm:$0xff]  }
  0x2b   :  { %2700 = vmatprep.mubr.msk.bf16.mxu0 %vm148_vm0, %v94_v5  ;;  %v95_v12 = vpack.c.bf16 %v65_v8, %v64_v7  ;;  %v96_v13 = vpack.c.bf16 %v67_v11, %v66_v10  ;;  %v2891_v15 = vld [vmem:[%s4742_s3 + $0x4] ss:$16 sps:$4 sm:$0xff]   ;;  %v69_v18 = vld [vmem:[%s4739_s0 + $0x38] sm:$0xff]  ;;  %v71_v20 = vld [vmem:[%s4739_s0 + $0x48] sm:$0xff]  ;;  %v3575_v5 = vmov 0  }
  0x2c   :  { %v68_v16 = vld [vmem:[%s4739_s0 + $0x30] sm:$0xff]  ;;  %2732 = vmatprep.subr.bf16.mxu1 %v2891_v15  ;;  %v70_v19 = vld [vmem:[%s4739_s0 + $0x40] sm:$0xff]  ;;  %v73_v28 = vld [vmem:[%s4739_s0 + $0x58] sm:$0xff]  ;;  %706 = vmatprep.mubr.bf16.mxu1 %v3575_v5 }
  0x2d   :  { %2695 = vmatpush3.bf16.msra.mxu0 %v2886_v1  ;;  %v2894_v17 = vld [vmem:[%s4742_s3 + $0x24] ss:$16 sps:$4 sm:$0xff]   ;;  %2740 = vmatpush1.bf16.msra.mxu1 %v2889_v14  ;;  %v2892_v21 = vld [vmem:[%s4742_s3 + $0x20] ss:$16 sps:$4 sm:$0xff]   ;;  %v97_v23 = vpack.c.bf16 %v69_v18, %v68_v16  ;;  %v98_v26 = vpack.c.bf16 %v71_v20, %v70_v19  ;;  %v75_v31 = vld [vmem:[%s4739_s0 + $0x68] sm:$0xff] }
  0x2e   :  { %2696 = vmatprep.subr.bf16.mxu0 %v2887_v2  ;;  %v2897_v22 = vld [vmem:[%s4742_s3 + $0x44] ss:$16 sps:$4 sm:$0xff]   ;;  %2733 = vmatprep.subr.bf16.mxu1 %v2894_v17  ;;  %v2895_v24 = vld [vmem:[%s4742_s3 + $0x40] ss:$16 sps:$4 sm:$0xff]   ;;  %v77_v38 = vld [vmem:[%s4739_s0 + $0x78] sm:$0xff] }
  0x2f   :  { %v2900_v25 = vld [vmem:[%s4742_s3 + $0x64] ss:$16 sps:$4 sm:$0xff]   ;;  %v2898_v29 = vld [vmem:[%s4742_s3 + $0x60] ss:$16 sps:$4 sm:$0xff]   ;;  %v79_v41 = vld [vmem:[%s4739_s0 + $0x88] sm:$0xff] }
  0x30   :  { %v72_v27 = vld [vmem:[%s4739_s0 + $0x50] sm:$0xff]  ;;  %v74_v30 = vld [vmem:[%s4739_s0 + $0x60] sm:$0xff]  ;;  %v81_v45 = vld [vmem:[%s4739_s0 + $0x98] sm:$0xff] }
  0x31   :  { %2697 = vmatpush3.bf16.msra.mxu0 %v2887_v2  ;;  %2741 = vmatpush1.bf16.msra.mxu1 %v2892_v21  ;;  %v2903_v32 = vld [vmem:[%s4742_s3 + $0x84] ss:$16 sps:$4 sm:$0xff]   ;;  %v2901_v33 = vld [vmem:[%s4742_s3 + $0x80] ss:$16 sps:$4 sm:$0xff]   ;;  %v99_v34 = vpack.c.bf16 %v73_v28, %v72_v27  ;;  %v100_v36 = vpack.c.bf16 %v75_v31, %v74_v30  ;;  %v83_v47 = vld [vmem:[%s4739_s0 + $0xa8] sm:$0xff] }
  0x32   :  { %2876 = vmatprep.subr.msk.bf16.mxu0 %vm197_vm1, %v2888_v6  ;;  %2734 = vmatprep.subr.bf16.mxu1 %v2897_v22  ;;  %v2906_v35 = vld [vmem:[%s4742_s3 + $0xa4] ss:$16 sps:$4 sm:$0xff]   ;;  %v2904_v39 = vld [vmem:[%s4742_s3 + $0xa0] ss:$16 sps:$4 sm:$0xff]   ;;  %v85_v51 = vld [vmem:[%s4739_s0 + $0xb8] sm:$0xff] }
  0x33   :  { %v76_v37 = vld [vmem:[%s4739_s0 + $0x70] sm:$0xff]  ;;  %v78_v40 = vld [vmem:[%s4739_s0 + $0x80] sm:$0xff]  ;;  %v87_v53 = vld [vmem:[%s4739_s0 + $0xc8] sm:$0xff] }
  0x34   :  { %v101_v42 = vpack.c.bf16 %v77_v38, %v76_v37  ;;  %v102_v43 = vpack.c.bf16 %v79_v41, %v78_v40  ;;  %v80_v44 = vld [vmem:[%s4739_s0 + $0x90] sm:$0xff]  ;;  %v82_v46 = vld [vmem:[%s4739_s0 + $0xa0] sm:$0xff]  ;;  %v89_v57 = vld [vmem:[%s4739_s0 + $0xd8] sm:$0xff] }
  0x35   :  { %2699 = vmatpush3.bf16.msra.mxu0 %v199_v9  ;;  %2742 = vmatpush1.bf16.msra.mxu1 %v2895_v24  ;;  %v103_v48 = vpack.c.bf16 %v81_v45, %v80_v44  ;;  %v104_v49 = vpack.c.bf16 %v83_v47, %v82_v46  ;;  %v84_v50 = vld [vmem:[%s4739_s0 + $0xb0] sm:$0xff]  ;;  %v86_v52 = vld [vmem:[%s4739_s0 + $0xc0] sm:$0xff]  ;;  %v91_v59 = vld [vmem:[%s4739_s0 + $0xe8] sm:$0xff] }
  0x36   :  { %624 = vmatprep.subr.bf16.mxu0 %v2891_v15  ;;  %2735 = vmatprep.subr.bf16.mxu1 %v2900_v25  ;;  %v105_v54 = vpack.c.bf16 %v85_v51, %v84_v50  ;;  %v106_v55 = vpack.c.bf16 %v87_v53, %v86_v52  ;;  %v88_v56 = vld [vmem:[%s4739_s0 + $0xd0] sm:$0xff]  ;;  %v90_v58 = vld [vmem:[%s4739_s0 + $0xe0] sm:$0xff]  ;;  %v93_v63 = vld [vmem:[%s4739_s0 + $0xf8] sm:$0xff] }
  0x37   :  { %v107_v60 = vpack.c.bf16 %v89_v57, %v88_v56  ;;  %v108_v61 = vpack.c.bf16 %v91_v59, %v90_v58  ;;  %v92_v62 = vld [vmem:[%s4739_s0 + $0xf0] sm:$0xff]  ;;  %v2915_v6 = vld [vmem:[%s4742_s3 + $0xc] ss:$16 sps:$4 sm:$0xff]   ;;  %v3822_v7 = vld [vmem:[%s4741_s2] ss:$0 sm:$0xff] }
  0x38   :  { %2701 = vmatmul.mubr.msk.bf16.vlgmr.msra.gmra.mrb[0].mxu0 %vm148_vm0, %v95_v12  ;;  %v109_v0 = vpack.c.bf16 %v93_v63, %v92_v62  ;;  %v2907_v1 = vld [vmem:[%s4742_s3 + $0xc0] ss:$16 sps:$4 sm:$0xff]   ;;  %v2909_v2 = vld [vmem:[%s4742_s3 + $0xc4] ss:$16 sps:$4 sm:$0xff]   ;;  %v2913_v30 = vld [vmem:[%s4742_s3 + $0x8] ss:$16 sps:$4 sm:$0xff]  }
  0x39   :  { %2704 = vmatprep.mubr.msk.bf16.mxu0 %vm148_vm0, %v96_v13  ;;  %625 = vmatpush1.bf16.msra.mxu0 %v2889_v14  ;;  %v2912_v3 = vld [vmem:[%s4742_s3 + $0xe4] ss:$16 sps:$4 sm:$0xff]   ;;  %v2910_v4 = vld [vmem:[%s4742_s3 + $0xe0] ss:$16 sps:$4 sm:$0xff]   ;;  %v2919_v47 = vld [vmem:[%s4742_s3 + $0x48] ss:$16 sps:$4 sm:$0xff]  }
  0x3a   :  { %626 = vmatprep.subr.bf16.mxu0 %v2894_v17  ;;  %2743 = vmatpush1.bf16.msra.mxu1 %v2898_v29  ;;  %v2924_v52 = vld [vmem:[%s4742_s3 + $0x6c] ss:$16 sps:$4 sm:$0xff]   ;;  %v2922_v59 = vld [vmem:[%s4742_s3 + $0x68] ss:$16 sps:$4 sm:$0xff]  }
  0x3b   :  { %2736 = vmatprep.subr.bf16.mxu1 %v2903_v32  ;;  %v2939_v57 = vld [vmem:[#allocation5 + $0x4] ss:$8 sps:$4 sm:$0xff]  }
  0x3d   :  { %627 = vmatpush1.bf16.msra.mxu0 %v2892_v21 }
  0x3e   :  { %628 = vmatprep.subr.bf16.mxu0 %v2897_v22  ;;  %2744 = vmatpush1.bf16.msra.mxu1 %v2901_v33 }
  0x3f   :  { %2737 = vmatprep.subr.bf16.mxu1 %v2906_v35 }
  0x40   :  { %2705 = vmatmul.mubr.msk.bf16.gmra.mrb[4].mxu0 %vm148_vm0, %v97_v23 }
  0x41   :  { %2708 = vmatprep.mubr.msk.bf16.mxu0 %vm148_vm0, %v98_v26  ;;  %629 = vmatpush1.bf16.msra.mxu0 %v2895_v24 }
  0x42   :  { %630 = vmatprep.subr.bf16.mxu0 %v2900_v25  ;;  %2745 = vmatpush1.bf16.msra.mxu1 %v2904_v39 }
  0x43   :  { %2738 = vmatprep.subr.bf16.mxu1 %v2909_v2 }
  0x45   :  { %631 = vmatpush1.bf16.msra.mxu0 %v2898_v29 }
  0x46   :  { %632 = vmatprep.subr.bf16.mxu0 %v2903_v32  ;;  %2746 = vmatpush1.bf16.msra.mxu1 %v2907_v1 }
  0x47   :  { %2739 = vmatprep.subr.bf16.mxu1 %v2912_v3 }
  0x48   :  { %2709 = vmatmul.mubr.msk.bf16.gmra.mrb[8].mxu0 %vm148_vm0, %v99_v34  ;;  %v2918_v34 = vld [vmem:[%s4742_s3 + $0x2c] ss:$16 sps:$4 sm:$0xff]  }
  0x49   :  { %2712 = vmatprep.mubr.msk.bf16.mxu0 %vm148_vm0, %v100_v36  ;;  %633 = vmatpush1.bf16.msra.mxu0 %v2901_v33 }
  0x4a   :  { %634 = vmatprep.subr.bf16.mxu0 %v2906_v35  ;;  %2747 = vmatpush1.bf16.msra.mxu1 %v2910_v4 }
  0x4b   :  { %1598 = vmatprep.subr.bf16.mxu1 %v2939_v57 }
  0x4d   :  { %635 = vmatpush1.bf16.msra.mxu0 %v2904_v39  ;;  %v2916_v39 = vld [vmem:[%s4742_s3 + $0x28] ss:$16 sps:$4 sm:$0xff]  }
  0x4e   :  { %636 = vmatprep.subr.bf16.mxu0 %v2909_v2 }
  0x50   :  { %2713 = vmatmul.mubr.msk.bf16.gmra.mrb[12].mxu0 %vm148_vm0, %v101_v42  ;;  %v2921_v42 = vld [vmem:[%s4742_s3 + $0x4c] ss:$16 sps:$4 sm:$0xff]  }
  0x51   :  { %2716 = vmatprep.mubr.msk.bf16.mxu0 %vm148_vm0, %v102_v43  ;;  %637 = vmatpush1.bf16.msra.mxu0 %v2907_v1  ;;  %v2925_v1 = vld [vmem:[%s4742_s3 + $0x88] ss:$16 sps:$4 sm:$0xff]  }
  0x52   :  { %638 = vmatprep.subr.bf16.mxu0 %v2912_v3 }
  0x55   :  { %639 = vmatpush1.bf16.msra.mxu0 %v2910_v4  ;;  %v2930_v4 = vld [vmem:[%s4742_s3 + $0xac] ss:$16 sps:$4 sm:$0xff]  }
  0x56   :  { %817 = vmatprep.subr.bf16.mxu0 %v2915_v6 }
  0x58   :  { %2717 = vmatmul.mubr.msk.bf16.gmra.mrb[16].mxu0 %vm148_vm0, %v103_v48 }
  0x59   :  { %2720 = vmatprep.mubr.msk.bf16.mxu0 %vm148_vm0, %v104_v49 }
  0x60   :  { %2721 = vmatmul.mubr.msk.bf16.gmra.mrb[20].mxu0 %vm148_vm0, %v105_v54 }
  0x61   :  { %2724 = vmatprep.mubr.msk.bf16.mxu0 %vm148_vm0, %v106_v55 }
  0x68   :  { %2725 = vmatmul.mubr.msk.bf16.gmra.mrb[24].mxu0 %vm148_vm0, %v107_v60 }
  0x69   :  { %2728 = vmatprep.mubr.msk.bf16.mxu0 %vm148_vm0, %v108_v61  ;;  %v2927_v61 = vld [vmem:[%s4742_s3 + $0x8c] ss:$16 sps:$4 sm:$0xff]  }
  0x70   :  { %2729 = vmatmul.mubr.msk.bf16.gmra.mrb[28].mxu0 %vm148_vm0, %v109_v0 }
  0x71   :  { %656 = vmatprep.mubr.bf16.mxu0 %v3575_v5 }
 0x10b   :  { %v2702_v8 = vpop.f32.mrb[0].mxu0 }
 0x10c   :  { %v244_v9 = vadd.f32 %v2702_v8, %v3822_v7  ;;  %v235_v10 = vpop.f32.mrb[1].mxu0 }
 0x10d   :  { %v236_v11 = vadd.f32 %v3822_v7, %v235_v10  ;;  %v2703_v12 = vpop.f32.mrb[2].mxu0  ;;  %v2937_v10 = vld [vmem:[#allocation5] ss:$8 sps:$4 sm:$0xff]  }
 0x10e   :  { %3049 = vtanh.f32 %v244_v9  ;;  %v247_v13 = vadd.f32 %v2703_v12, %v3822_v7  ;;  %v238_v14 = vpop.f32.mrb[3].mxu0 }
 0x10f   :  { %3051 = vtanh.f32 %v236_v11  ;;  %v239_v15 = vadd.f32 %v3822_v7, %v238_v14 }
 0x110   :  { %3053 = vtanh.f32 %v247_v13 }
 0x111   :  { %3055 = vtanh.f32 %v239_v15  ;;  %v2942_v15 = vld [vmem:[#allocation5 + $0x14] ss:$8 sps:$4 sm:$0xff]  }
 0x113   :  { %v2706_v16 = vpop.f32.mrb[4].mxu0 }
 0x114   :  { %v260_v17 = vadd.f32 %v2706_v16, %v3822_v7  ;;  %v251_v18 = vpop.f32.mrb[5].mxu0  ;;  %v2928_v16 = vld [vmem:[%s4742_s3 + $0xa8] ss:$16 sps:$4 sm:$0xff]  }
 0x115   :  { %v252_v19 = vadd.f32 %v3822_v7, %v251_v18  ;;  %v2707_v20 = vpop.f32.mrb[6].mxu0 }
 0x116   :  { %3057 = vtanh.f32 %v260_v17  ;;  %v263_v21 = vadd.f32 %v2707_v20, %v3822_v7  ;;  %v254_v22 = vpop.f32.mrb[7].mxu0  ;;  %v2940_v20 = vld [vmem:[#allocation5 + $0x10] ss:$8 sps:$4 sm:$0xff]  }
 0x117   :  { %3059 = vtanh.f32 %v252_v19  ;;  %v255_v23 = vadd.f32 %v3822_v7, %v254_v22  ;;  %v2933_v19 = vld [vmem:[%s4742_s3 + $0xcc] ss:$16 sps:$4 sm:$0xff]  }
 0x118   :  { %v3050_v24 = vpop.eup %3049  ;;  %3061 = vtanh.f32 %v263_v21 }
 0x119   :  { %v3052_v25 = vpop.eup %3051  ;;  %3063 = vtanh.f32 %v255_v23 }
 0x11a   :  { %v3054_v26 = vpop.eup %3053 }
 0x11b   :  { %v3056_v27 = vpop.eup %3055  ;;  %v2710_v28 = vpop.f32.mrb[8].mxu0  ;;  %v3832_v29 = vpack.c.bf16 %v3054_v26, %v3050_v24  ;;  %v2931_v24 = vld [vmem:[%s4742_s3 + $0xc8] ss:$16 sps:$4 sm:$0xff]  }
 0x11c   :  { %v3837_v31 = vpack.c.bf16 %v3056_v27, %v3052_v25  ;;  %v276_v32 = vadd.f32 %v2710_v28, %v3822_v7  ;;  %v267_v33 = vpop.f32.mrb[9].mxu0  ;;  %v2936_v28 = vld [vmem:[%s4742_s3 + $0xec] ss:$16 sps:$4 sm:$0xff]  }
 0x11d   :  { %v268_v35 = vadd.f32 %v3822_v7, %v267_v33  ;;  %v2711_v36 = vpop.f32.mrb[10].mxu0 }
 0x11e   :  { %657 = vmatmul.mubr.bf16.vlgmr.msra.gmra.mrb[32].mxu0 %v3837_v31  ;;  %3065 = vtanh.f32 %v276_v32  ;;  %v279_v37 = vadd.f32 %v2711_v36, %v3822_v7  ;;  %v270_v38 = vpop.f32.mrb[11].mxu0 }
 0x11f   :  { %666 = vmatprep.mubr.bf16.mxu0 %v3575_v5  ;;  %3067 = vtanh.f32 %v268_v35  ;;  %818 = vmatpush1.bf16.msra.mxu0 %v2913_v30  ;;  %v271_v40 = vadd.f32 %v3822_v7, %v270_v38  ;;  %v2945_v38 = vld [vmem:[#allocation5 + $0x24] ss:$8 sps:$4 sm:$0xff]  }
 0x120   :  { %v3058_v41 = vpop.eup %3057  ;;  %3069 = vtanh.f32 %v279_v37  ;;  %819 = vmatprep.subr.bf16.mxu0 %v2918_v34  ;;  %v2943_v37 = vld [vmem:[#allocation5 + $0x20] ss:$8 sps:$4 sm:$0xff]  }
 0x121   :  { %v3060_v43 = vpop.eup %3059  ;;  %3071 = vtanh.f32 %v271_v40 }
 0x122   :  { %v3062_v44 = vpop.eup %3061 }
 0x123   :  { %v3064_v45 = vpop.eup %3063  ;;  %820 = vmatpush1.bf16.msra.mxu0 %v2916_v39  ;;  %v2714_v46 = vpop.f32.mrb[12].mxu0  ;;  %v3857_v48 = vpack.c.bf16 %v3062_v44, %v3058_v41  ;;  %v2934_v39 = vld [vmem:[%s4742_s3 + $0xe8] ss:$16 sps:$4 sm:$0xff]   ;;  %v2948_v41 = vld [vmem:[#allocation5 + $0x34] ss:$8 sps:$4 sm:$0xff]  }
 0x124   :  { %v292_v49 = vadd.f32 %v2714_v46, %v3822_v7  ;;  %v283_v50 = vpop.f32.mrb[13].mxu0  ;;  %v3860_v51 = vpack.c.bf16 %v3064_v45, %v3060_v43  ;;  %821 = vmatprep.subr.bf16.mxu0 %v2921_v42 }
 0x125   :  { %v284_v53 = vadd.f32 %v3822_v7, %v283_v50  ;;  %v2715_v54 = vpop.f32.mrb[14].mxu0 }
 0x126   :  { %667 = vmatmul.mubr.bf16.gmra.mrb[36].mxu0 %v3832_v29  ;;  %3073 = vtanh.f32 %v292_v49  ;;  %v295_v55 = vadd.f32 %v2715_v54, %v3822_v7  ;;  %v286_v56 = vpop.f32.mrb[15].mxu0 }
 0x127   :  { %676 = vmatprep.mubr.bf16.mxu0 %v3575_v5  ;;  %3075 = vtanh.f32 %v284_v53  ;;  %822 = vmatpush1.bf16.msra.mxu0 %v2919_v47  ;;  %v287_v58 = vadd.f32 %v3822_v7, %v286_v56  ;;  %v2946_v53 = vld [vmem:[#allocation5 + $0x30] ss:$8 sps:$4 sm:$0xff]  }
 0x128   :  { %v3066_v60 = vpop.eup %3065  ;;  %3077 = vtanh.f32 %v295_v55  ;;  %823 = vmatprep.subr.bf16.mxu0 %v2924_v52 }
 0x129   :  { %v3068_v62 = vpop.eup %3067  ;;  %3079 = vtanh.f32 %v287_v58  ;;  %v2951_v58 = vld [vmem:[#allocation5 + $0x44] ss:$8 sps:$4 sm:$0xff]  }
 0x12a   :  { %v3070_v63 = vpop.eup %3069 }
 0x12b   :  { %v3072_v0 = vpop.eup %3071  ;;  %824 = vmatpush1.bf16.msra.mxu0 %v2922_v59  ;;  %v3879_v2 = vpack.c.bf16 %v3070_v63, %v3066_v60  ;;  %v2718_v3 = vpop.f32.mrb[16].mxu0  ;;  %v2954_v63 = vld [vmem:[#allocation5 + $0x54] ss:$8 sps:$4 sm:$0xff]  }
 0x12c   :  { %825 = vmatprep.subr.bf16.mxu0 %v2927_v61  ;;  %v308_v6 = vadd.f32 %v2718_v3, %v3822_v7  ;;  %v299_v8 = vpop.f32.mrb[17].mxu0  ;;  %v3885_v9 = vpack.c.bf16 %v3072_v0, %v3068_v62  ;;  %v2949_v61 = vld [vmem:[#allocation5 + $0x40] ss:$8 sps:$4 sm:$0xff]  }
 0x12d   :  { %707 = vmatmul.mubr.bf16.vlgmr.msra.gmra.mrb[0].mxu1 %v3879_v2  ;;  %v300_v11 = vadd.f32 %v3822_v7, %v299_v8  ;;  %v2719_v12 = vpop.f32.mrb[18].mxu0 }
 0x12e   :  { %677 = vmatmul.mubr.bf16.gmra.mrb[40].mxu0 %v3860_v51  ;;  %3081 = vtanh.f32 %v308_v6  ;;  %v311_v13 = vadd.f32 %v2719_v12, %v3822_v7  ;;  %716 = vmatprep.mubr.bf16.mxu1 %v3575_v5  ;;  %v302_v14 = vpop.f32.mrb[19].mxu0 }
 0x12f   :  { %686 = vmatprep.mubr.bf16.mxu0 %v3575_v5  ;;  %826 = vmatpush1.bf16.msra.mxu0 %v2925_v1  ;;  %3083 = vtanh.f32 %v300_v11  ;;  %v303_v17 = vadd.f32 %v3822_v7, %v302_v14  ;;  %v2952_v11 = vld [vmem:[#allocation5 + $0x50] ss:$8 sps:$4 sm:$0xff]   ;;  %v2957_v14 = vld [vmem:[#allocation5 + $0x64] ss:$8 sps:$4 sm:$0xff]  }
 0x130   :  { %v3074_v18 = vpop.eup %3073  ;;  %827 = vmatprep.subr.bf16.mxu0 %v2930_v4  ;;  %3085 = vtanh.f32 %v311_v13  ;;  %1599 = vmatpush1.bf16.msra.mxu1 %v2937_v10 }
 0x131   :  { %v3076_v21 = vpop.eup %3075  ;;  %3087 = vtanh.f32 %v303_v17  ;;  %1600 = vmatprep.subr.bf16.mxu1 %v2942_v15 }
 0x132   :  { %v3078_v22 = vpop.eup %3077 }
 0x133   :  { %v3080_v23 = vpop.eup %3079  ;;  %828 = vmatpush1.bf16.msra.mxu0 %v2928_v16  ;;  %v3903_v25 = vpack.c.bf16 %v3078_v22, %v3074_v18  ;;  %v2722_v26 = vpop.f32.mrb[20].mxu0 }
 0x134   :  { %829 = vmatprep.subr.bf16.mxu0 %v2933_v19  ;;  %v3905_v27 = vpack.c.bf16 %v3080_v23, %v3076_v21  ;;  %v324_v30 = vadd.f32 %v2722_v26, %v3822_v7  ;;  %v315_v32 = vpop.f32.mrb[21].mxu0  ;;  %1601 = vmatpush1.bf16.msra.mxu1 %v2940_v20  ;;  %v2955_v19 = vld [vmem:[#allocation5 + $0x60] ss:$8 sps:$4 sm:$0xff]   ;;  %v2958_v26 = vld [vmem:[#allocation5 + $0x70] ss:$8 sps:$4 sm:$0xff]  }
 0x135   :  { %v316_v33 = vadd.f32 %v3822_v7, %v315_v32  ;;  %v2723_v34 = vpop.f32.mrb[22].mxu0  ;;  %1602 = vmatprep.subr.bf16.mxu1 %v2945_v38  ;;  %v2969_v38 = vld [vmem:[#allocation5 + $0xa4] ss:$8 sps:$4 sm:$0xff]  }
 0x136   :  { %687 = vmatmul.mubr.bf16.gmra.mrb[44].mxu0 %v3857_v48  ;;  %717 = vmatmul.mubr.bf16.gmra.mrb[4].mxu1 %v3905_v27  ;;  %3089 = vtanh.f32 %v324_v30  ;;  %v327_v35 = vadd.f32 %v2723_v34, %v3822_v7  ;;  %v318_v36 = vpop.f32.mrb[23].mxu0  ;;  %v2961_v30 = vld [vmem:[#allocation5 + $0x80] ss:$8 sps:$4 sm:$0xff]  }
 0x137   :  { %696 = vmatprep.mubr.bf16.mxu0 %v3575_v5  ;;  %830 = vmatpush1.bf16.msra.mxu0 %v2931_v24  ;;  %3091 = vtanh.f32 %v316_v33  ;;  %v319_v40 = vadd.f32 %v3822_v7, %v318_v36  ;;  %v2966_v33 = vld [vmem:[#allocation5 + $0x94] ss:$8 sps:$4 sm:$0xff]  }
 0x138   :  { %v3082_v42 = vpop.eup %3081  ;;  %831 = vmatprep.subr.bf16.mxu0 %v2936_v28  ;;  %726 = vmatprep.mubr.bf16.mxu1 %v3575_v5  ;;  %3093 = vtanh.f32 %v327_v35  ;;  %v2963_v28 = vld [vmem:[#allocation5 + $0x84] ss:$8 sps:$4 sm:$0xff]  }
 0x139   :  { %v3084_v43 = vpop.eup %3083  ;;  %3095 = vtanh.f32 %v319_v40  ;;  %1603 = vmatpush1.bf16.msra.mxu1 %v2943_v37  ;;  %v2972_v40 = vld [vmem:[#allocation5 + $0xb4] ss:$8 sps:$4 sm:$0xff]  }
 0x13a   :  { %v3086_v44 = vpop.eup %3085  ;;  %1604 = vmatprep.subr.bf16.mxu1 %v2948_v41  ;;  %v2970_v41 = vld [vmem:[#allocation5 + $0xb0] ss:$8 sps:$4 sm:$0xff]  }
 0x13b   :  { %v3088_v45 = vpop.eup %3087  ;;  %832 = vmatpush1.bf16.msra.mxu0 %v2934_v39  ;;  %v3921_v46 = vpack.c.bf16 %v3086_v44, %v3082_v42  ;;  %v2726_v47 = vpop.f32.mrb[24].mxu0  ;;  %v2967_v39 = vld [vmem:[#allocation5 + $0xa0] ss:$8 sps:$4 sm:$0xff]   ;;  %v2975_v42 = vld [vmem:[#allocation5 + $0xc4] ss:$8 sps:$4 sm:$0xff]  }
 0x13c   :  { %v3923_v49 = vpack.c.bf16 %v3088_v45, %v3084_v43  ;;  %v340_v50 = vadd.f32 %v2726_v47, %v3822_v7  ;;  %v331_v52 = vpop.f32.mrb[25].mxu0  ;;  %v2981_v43 = vld [vmem:[#allocation5 + $0xe4] ss:$8 sps:$4 sm:$0xff]   ;;  %v2984_v44 = vld [vmem:[#allocation5 + $0xf4] ss:$8 sps:$4 sm:$0xff]  }
 0x13d   :  { %v332_v54 = vadd.f32 %v3822_v7, %v331_v52  ;;  %v2727_v55 = vpop.f32.mrb[26].mxu0  ;;  %1605 = vmatpush1.bf16.msra.mxu1 %v2946_v53  ;;  %v2987_v45 = vld [vmem:[#allocation5 + $0x104] ss:$8 sps:$4 sm:$0xff]  }
 0x13e   :  { %697 = vmatmul.mubr.bf16.gmra.mrb[48].mxu0 %v3885_v9  ;;  %727 = vmatmul.mubr.bf16.gmra.mrb[8].mxu1 %v3903_v25  ;;  %3097 = vtanh.f32 %v340_v50  ;;  %v343_v56 = vadd.f32 %v2727_v55, %v3822_v7  ;;  %v334_v57 = vpop.f32.mrb[27].mxu0 }
 0x13f   :  { %849 = vmatprep.mubr.bf16.mxu0 %v3575_v5  ;;  %736 = vmatprep.mubr.bf16.mxu1 %v3575_v5  ;;  %3099 = vtanh.f32 %v332_v54  ;;  %v335_v59 = vadd.f32 %v3822_v7, %v334_v57 }
 0x140   :  { %v3090_v60 = vpop.eup %3089  ;;  %3101 = vtanh.f32 %v343_v56  ;;  %1606 = vmatprep.subr.bf16.mxu1 %v2951_v58 }
 0x141   :  { %v3092_v62 = vpop.eup %3091  ;;  %3103 = vtanh.f32 %v335_v59  ;;  %1607 = vmatpush1.bf16.msra.mxu1 %v2949_v61 }
 0x142   :  { %v3094_v0 = vpop.eup %3093  ;;  %1608 = vmatprep.subr.bf16.mxu1 %v2954_v63 }
 0x143   :  { %v3096_v1 = vpop.eup %3095  ;;  %v3933_v3 = vpack.c.bf16 %v3094_v0, %v3090_v60  ;;  %v2730_v4 = vpop.f32.mrb[28].mxu0 }
 0x144   :  { %v3935_v6 = vpack.c.bf16 %v3096_v1, %v3092_v62  ;;  %v356_v8 = vadd.f32 %v2730_v4, %v3822_v7  ;;  %v347_v10 = vpop.f32.mrb[29].mxu0 }
 0x145   :  { %v348_v12 = vadd.f32 %v3822_v7, %v347_v10  ;;  %v2731_v13 = vpop.f32.mrb[30].mxu0  ;;  %1609 = vmatpush1.bf16.msra.mxu1 %v2952_v11 }
 0x146   :  { %850 = vmatmul.mubr.bf16.vlgmr.msra.gmra.mrb[52].mxu0 %v3837_v31  ;;  %737 = vmatmul.mubr.bf16.gmra.mrb[12].mxu1 %v3923_v49  ;;  %3105 = vtanh.f32 %v356_v8  ;;  %v359_v15 = vadd.f32 %v2731_v13, %v3822_v7  ;;  %v350_v16 = vpop.f32.mrb[31].mxu0  ;;  %v2960_v31 = vld [vmem:[#allocation5 + $0x74] ss:$8 sps:$4 sm:$0xff]  }
 0x147   :  { %859 = vmatprep.mubr.bf16.mxu0 %v3575_v5  ;;  %746 = vmatprep.mubr.bf16.mxu1 %v3575_v5  ;;  %3107 = vtanh.f32 %v348_v12  ;;  %v351_v17 = vadd.f32 %v3822_v7, %v350_v16 }
 0x148   :  { %v3098_v18 = vpop.eup %3097  ;;  %3109 = vtanh.f32 %v359_v15  ;;  %1610 = vmatprep.subr.bf16.mxu1 %v2957_v14 }
 0x149   :  { %v3100_v20 = vpop.eup %3099  ;;  %3111 = vtanh.f32 %v351_v17  ;;  %1611 = vmatpush1.bf16.msra.mxu1 %v2955_v19 }
 0x14a   :  { %v3102_v21 = vpop.eup %3101  ;;  %1612 = vmatprep.subr.bf16.mxu1 %v2960_v31  ;;  %v2985_v31 = vld [vmem:[#allocation5 + $0x100] ss:$8 sps:$4 sm:$0xff]  }
 0x14b   :  { %v3104_v22 = vpop.eup %3103  ;;  %v3945_v23 = vpack.c.bf16 %v3102_v21, %v3098_v18 }
 0x14c   :  { %v3947_v24 = vpack.c.bf16 %v3104_v22, %v3100_v20 }
 0x14d   :  { %1613 = vmatpush1.bf16.msra.mxu1 %v2958_v26 }
 0x14e   :  { %860 = vmatmul.mubr.bf16.gmra.mrb[56].mxu0 %v3832_v29  ;;  %747 = vmatmul.mubr.bf16.gmra.mrb[16].mxu1 %v3921_v46  ;;  %v2964_v29 = vld [vmem:[#allocation5 + $0x90] ss:$8 sps:$4 sm:$0xff]  }
 0x14f   :  { %869 = vmatprep.mubr.bf16.mxu0 %v3575_v5  ;;  %756 = vmatprep.mubr.bf16.mxu1 %v3575_v5 }
 0x150   :  { %v3106_v7 = vpop.eup %3105  ;;  %1614 = vmatprep.subr.bf16.mxu1 %v2963_v28 }
 0x151   :  { %v3108_v32 = vpop.eup %3107  ;;  %1615 = vmatpush1.bf16.msra.mxu1 %v2961_v30 }
 0x152   :  { %v3110_v34 = vpop.eup %3109  ;;  %1616 = vmatprep.subr.bf16.mxu1 %v2966_v33 }
 0x153   :  { %v3112_v35 = vpop.eup %3111  ;;  %v3953_v36 = vpack.c.bf16 %v3110_v34, %v3106_v7 }
 0x154   :  { %v3955_v37 = vpack.c.bf16 %v3112_v35, %v3108_v32  ;;  %v2988_v35 = vld [vmem:[#allocation5 + $0x110] ss:$8 sps:$4 sm:$0xff]  }
 0x155   :  { %1617 = vmatpush1.bf16.msra.mxu1 %v2964_v29  ;;  %v2993_v29 = vld [vmem:[#allocation5 + $0x124] ss:$8 sps:$4 sm:$0xff]  }
 0x156   :  { %870 = vmatmul.mubr.bf16.gmra.mrb[60].mxu0 %v3860_v51  ;;  %757 = vmatmul.mubr.bf16.gmra.mrb[20].mxu1 %v3935_v6  ;;  %v2973_v51 = vld [vmem:[#allocation5 + $0xc0] ss:$8 sps:$4 sm:$0xff]  }
 0x157   :  { %879 = vmatprep.mubr.bf16.mxu0 %v3575_v5  ;;  %766 = vmatprep.mubr.bf16.mxu1 %v3575_v5 }
 0x158   :  { %1618 = vmatprep.subr.bf16.mxu1 %v2969_v38 }
 0x159   :  { %1619 = vmatpush1.bf16.msra.mxu1 %v2967_v39 }
 0x15a   :  { %1620 = vmatprep.subr.bf16.mxu1 %v2972_v40 }
 0x15d   :  { %1621 = vmatpush1.bf16.msra.mxu1 %v2970_v41 }
 0x15e   :  { %880 = vmatmul.mubr.bf16.gmra.mrb[64].mxu0 %v3857_v48  ;;  %767 = vmatmul.mubr.bf16.gmra.mrb[24].mxu1 %v3933_v3  ;;  %v2976_v48 = vld [vmem:[#allocation5 + $0xd0] ss:$8 sps:$4 sm:$0xff]  }
 0x15f   :  { %889 = vmatprep.mubr.bf16.mxu0 %v3575_v5  ;;  %776 = vmatprep.mubr.bf16.mxu1 %v3575_v5 }
 0x160   :  { %1622 = vmatprep.subr.bf16.mxu1 %v2975_v42 }
 0x161   :  { %1623 = vmatpush1.bf16.msra.mxu1 %v2973_v51 }
 0x166   :  { %890 = vmatmul.mubr.bf16.gmra.mrb[68].mxu0 %v3885_v9  ;;  %777 = vmatmul.mubr.bf16.gmra.mrb[28].mxu1 %v3947_v24  ;;  %v2978_v9 = vld [vmem:[#allocation5 + $0xd4] ss:$8 sps:$4 sm:$0xff]  }
 0x167   :  { %899 = vmatprep.mubr.bf16.mxu0 %v3575_v5  ;;  %786 = vmatprep.mubr.bf16.mxu1 %v3575_v5 }
 0x168   :  { %1624 = vmatprep.subr.bf16.mxu1 %v2978_v9 }
 0x169   :  { %1625 = vmatpush1.bf16.msra.mxu1 %v2976_v48 }
 0x16a   :  { %1626 = vmatprep.subr.bf16.mxu1 %v2981_v43  ;;  %v2991_v43 = vld [vmem:[#allocation5 + $0x120] ss:$8 sps:$4 sm:$0xff]  }
 0x16e   :  { %900 = vmatmul.mubr.bf16.gmra.mrb[72].mxu0 %v3879_v2  ;;  %787 = vmatmul.mubr.bf16.gmra.mrb[32].mxu1 %v3945_v23  ;;  %v2979_v2 = vld [vmem:[#allocation5 + $0xe0] ss:$8 sps:$4 sm:$0xff]  }
 0x16f   :  { %909 = vmatprep.mubr.bf16.mxu0 %v3575_v5  ;;  %796 = vmatprep.mubr.bf16.mxu1 %v3575_v5 }
 0x170   :  { %1627 = vmatpush1.bf16.msra.mxu1 %v2979_v2 }
 0x171   :  { %1628 = vmatprep.subr.bf16.mxu1 %v2984_v44 }
 0x176   :  { %910 = vmatmul.mubr.bf16.gmra.mrb[76].mxu0 %v3905_v27  ;;  %797 = vmatmul.mubr.bf16.gmra.mrb[36].mxu1 %v3955_v37  ;;  %v2982_v27 = vld [vmem:[#allocation5 + $0xf0] ss:$8 sps:$4 sm:$0xff]  }
 0x177   :  { %919 = vmatprep.mubr.bf16.mxu0 %v3575_v5  ;;  %806 = vmatprep.mubr.bf16.mxu1 %v3575_v5 }
 0x178   :  { %1629 = vmatpush1.bf16.msra.mxu1 %v2982_v27 }
 0x179   :  { %1791 = vmatprep.subr.bf16.mxu1 %v2987_v45 }
 0x17e   :  { %920 = vmatmul.mubr.bf16.gmra.mrb[80].mxu0 %v3903_v25  ;;  %807 = vmatmul.mubr.bf16.gmra.mrb[40].mxu1 %v3953_v36  ;;  %v444_v25 = vlaneseq }
 0x17f   :  { %929 = vmatprep.mubr.bf16.mxu0 %v3575_v5 }
 0x186   :  { %930 = vmatmul.mubr.bf16.gmra.mrb[84].mxu0 %v3923_v49  ;;  %v4001_v49 = vld [vmem:[%s4743_s4] sm:$0xf] }
 0x187   :  { %939 = vmatprep.mubr.bf16.mxu0 %v3575_v5 }
 0x18e   :  { %940 = vmatmul.mubr.bf16.gmra.mrb[88].mxu0 %v3921_v46  ;;  %v3995_v46 = vshrl.u32 %v444_v25, 7  ;;  %v2996_v25 = vld [vmem:[#allocation5 + $0x134] ss:$8 sps:$4 sm:$0xff]  }
 0x18f   :  { %949 = vmatprep.mubr.bf16.mxu0 %v3575_v5 }
 0x190   :  { %v4750_v47 = vsub.s32 0, %v3995_v46  ;;  %v4749_v50 = vsub.s32 1, %v3995_v46 }
 0x192   :  { %v4007_v52 = vrot.slane %v4001_v49, %v4750_v47 }
 0x196   :  { %950 = vmatmul.mubr.bf16.gmra.mrb[92].mxu0 %v3935_v6 }
 0x197   :  { %959 = vmatprep.mubr.bf16.mxu0 %v3575_v5 }
 0x19e   :  { %960 = vmatmul.mubr.bf16.gmra.mrb[96].mxu0 %v3933_v3 }
 0x19f   :  { %969 = vmatprep.mubr.bf16.mxu0 %v3575_v5 }
 0x1a6   :  { %970 = vmatmul.mubr.bf16.gmra.mrb[100].mxu0 %v3947_v24  ;;  %v2990_v24 = vld [vmem:[#allocation5 + $0x114] ss:$8 sps:$4 sm:$0xff]  }
 0x1a7   :  { %979 = vmatprep.mubr.bf16.mxu0 %v3575_v5 }
 0x1ae   :  { %980 = vmatmul.mubr.bf16.gmra.mrb[104].mxu0 %v3945_v23 }
 0x1af   :  { %989 = vmatprep.mubr.bf16.mxu0 %v3575_v5 }
 0x1b6   :  { %990 = vmatmul.mubr.bf16.gmra.mrb[108].mxu0 %v3955_v37 }
 0x1b7   :  { %999 = vmatprep.mubr.bf16.mxu0 %v3575_v5  ;;  %v4012_v5 = vrot.slane %v4001_v49, %v4749_v50 }
 0x1be   :  { %1000 = vmatmul.mubr.bf16.gmra.mrb[112].mxu0 %v3953_v36 }
 0x1f1   :  { %v658_v53 = vpop.f32.mrb[32].mxu0 }
 0x1f2   :  { %v659_v54 = vadd.f32 %v658_v53, %v4007_v52  ;;  %v660_v55 = vpop.f32.mrb[33].mxu0 }
 0x1f3   :  { %v661_v56 = vadd.f32 %v660_v55, %v4012_v5  ;;  %v662_v57 = vpop.f32.mrb[34].mxu0 }
 0x1f4   :  { %3113 = vtanh.f32 %v659_v54  ;;  %v663_v58 = vadd.f32 %v662_v57, %v4007_v52  ;;  %v664_v59 = vpop.f32.mrb[35].mxu0 }
 0x1f5   :  { %3115 = vtanh.f32 %v661_v56  ;;  %v665_v60 = vadd.f32 %v664_v59, %v4012_v5 }
 0x1f6   :  { %3117 = vtanh.f32 %v663_v58 }
 0x1f7   :  { %3119 = vtanh.f32 %v665_v60 }
 0x1f9   :  { %v668_v61 = vpop.f32.mrb[36].mxu0 }
 0x1fa   :  { %v669_v62 = vadd.f32 %v668_v61, %v4007_v52  ;;  %v670_v63 = vpop.f32.mrb[37].mxu0 }
 0x1fb   :  { %v671_v0 = vadd.f32 %v670_v63, %v4012_v5  ;;  %v672_v1 = vpop.f32.mrb[38].mxu0 }
 0x1fc   :  { %3121 = vtanh.f32 %v669_v62  ;;  %v673_v3 = vadd.f32 %v672_v1, %v4007_v52  ;;  %v674_v4 = vpop.f32.mrb[39].mxu0  ;;  %v2994_v62 = vld [vmem:[#allocation5 + $0x130] ss:$8 sps:$4 sm:$0xff]   ;;  %v2999_v1 = vld [vmem:[#allocation5 + $0x144] ss:$8 sps:$4 sm:$0xff]  }
 0x1fd   :  { %3123 = vtanh.f32 %v671_v0  ;;  %v675_v6 = vadd.f32 %v674_v4, %v4012_v5 }
 0x1fe   :  { %v3114_v8 = vpop.eup %3113  ;;  %3125 = vtanh.f32 %v673_v3 }
 0x1ff   :  { %v3116_v10 = vpop.eup %3115  ;;  %3127 = vtanh.f32 %v675_v6 }
 0x200   :  { %v3118_v11 = vpop.eup %3117  ;;  %v708_v12 = vpop.f32.mrb[0].mxu1 }
 0x201   :  { %v3120_v13 = vpop.eup %3119  ;;  %v678_v14 = vpop.f32.mrb[40].mxu0  ;;  %v1138_v15 = vpack.c.bf16 %v3118_v11, %v3114_v8  ;;  %v709_v16 = vadd.f32 %v708_v12, %v4007_v52 }
 0x202   :  { %v710_v17 = vpop.f32.mrb[1].mxu1  ;;  %v679_v18 = vadd.f32 %v678_v14, %v4007_v52  ;;  %v680_v19 = vpop.f32.mrb[41].mxu0  ;;  %v1139_v20 = vpack.c.bf16 %v3120_v13, %v3116_v10 }
 0x203   :  { %v712_v21 = vpop.f32.mrb[2].mxu1  ;;  %v681_v22 = vadd.f32 %v680_v19, %v4012_v5  ;;  %v682_v23 = vpop.f32.mrb[42].mxu0  ;;  %3129 = vtanh.f32 %v709_v16  ;;  %v711_v30 = vadd.f32 %v710_v17, %v4012_v5  ;;  %v2997_v17 = vld [vmem:[#allocation5 + $0x140] ss:$8 sps:$4 sm:$0xff]  }
 0x204   :  { %v714_v26 = vpop.f32.mrb[3].mxu1  ;;  %3131 = vtanh.f32 %v679_v18  ;;  %v683_v28 = vadd.f32 %v682_v23, %v4007_v52  ;;  %v684_v7 = vpop.f32.mrb[43].mxu0  ;;  %1630 = vmatprep.mubr.bf16.mxu1 %v1139_v20  ;;  %v713_v33 = vadd.f32 %v712_v21, %v4007_v52 }
 0x205   :  { %3133 = vtanh.f32 %v681_v22  ;;  %v685_v32 = vadd.f32 %v684_v7, %v4012_v5  ;;  %1631 = vmatmul.mubr.bf16.vlgmr.msra.gmra.mrb[44].mxu1 %v1138_v15  ;;  %v715_v36 = vadd.f32 %v714_v26, %v4012_v5  ;;  %v454_v15 = vsub.s32 2, %v3995_v46  ;;  %v3002_v22 = vld [vmem:[#allocation5 + $0x154] ss:$8 sps:$4 sm:$0xff]  }
 0x206   :  { %v3122_v34 = vpop.eup %3121  ;;  %3135 = vtanh.f32 %v683_v28  ;;  %1792 = vmatpush1.bf16.msra.mxu1 %v2985_v31  ;;  %v458_v31 = vsub.s32 3, %v3995_v46 }
 0x207   :  { %v3124_v37 = vpop.eup %3123  ;;  %3137 = vtanh.f32 %v685_v32  ;;  %1793 = vmatprep.subr.bf16.mxu1 %v2990_v24 }
 0x208   :  { %v3126_v38 = vpop.eup %3125  ;;  %3139 = vtanh.f32 %v711_v30 }
 0x209   :  { %v3128_v39 = vpop.eup %3127  ;;  %v688_v40 = vpop.f32.mrb[44].mxu0  ;;  %3141 = vtanh.f32 %v713_v33  ;;  %v1142_v41 = vpack.c.bf16 %v3126_v38, %v3122_v34 }
 0x20a   :  { %v718_v42 = vpop.f32.mrb[4].mxu1  ;;  %v689_v51 = vadd.f32 %v688_v40, %v4007_v52  ;;  %v690_v48 = vpop.f32.mrb[45].mxu0  ;;  %v1143_v9 = vpack.c.bf16 %v3128_v39, %v3124_v37  ;;  %1794 = vmatpush1.bf16.msra.mxu1 %v2988_v35  ;;  %3143 = vtanh.f32 %v715_v36  ;;  %v4059_v36 = vrot.slane %v4001_v49, %v454_v15  ;;  %v3011_v15 = vld [vmem:[#allocation5 + $0x184] ss:$8 sps:$4 sm:$0xff]  }
 0x20b   :  { %v720_v2 = vpop.f32.mrb[5].mxu1  ;;  %v691_v27 = vadd.f32 %v690_v48, %v4012_v5  ;;  %v692_v44 = vpop.f32.mrb[46].mxu0  ;;  %1795 = vmatprep.subr.bf16.mxu1 %v2993_v29  ;;  %v719_v55 = vadd.f32 %v718_v42, %v4007_v52  ;;  %v3000_v29 = vld [vmem:[#allocation5 + $0x150] ss:$8 sps:$4 sm:$0xff]   ;;  %v4063_v39 = vrot.slane %v4001_v49, %v458_v31 }
 0x20c   :  { %v722_v45 = vpop.f32.mrb[6].mxu1  ;;  %3145 = vtanh.f32 %v689_v51  ;;  %v693_v53 = vadd.f32 %v692_v44, %v4007_v52  ;;  %v694_v54 = vpop.f32.mrb[47].mxu0  ;;  %1640 = vmatprep.mubr.bf16.mxu1 %v1143_v9  ;;  %v721_v59 = vadd.f32 %v720_v2, %v4012_v5 }
 0x20d   :  { %v724_v56 = vpop.f32.mrb[7].mxu1  ;;  %v4034_v57 = vpop.eup %3129  ;;  %3147 = vtanh.f32 %v691_v27  ;;  %v695_v58 = vadd.f32 %v694_v54, %v4012_v5  ;;  %1641 = vmatmul.mubr.bf16.gmra.mrb[48].mxu1 %v1142_v41  ;;  %v723_v61 = vadd.f32 %v722_v45, %v4007_v52  ;;  %v3005_v41 = vld [vmem:[#allocation5 + $0x164] ss:$8 sps:$4 sm:$0xff]  }
 0x20e   :  { %v3132_v60 = vpop.eup %3131  ;;  %3149 = vtanh.f32 %v693_v53  ;;  %1796 = vmatpush1.bf16.msra.mxu1 %v2991_v43  ;;  %v725_v0 = vadd.f32 %v724_v56, %v4012_v5 }
 0x20f   :  { %v3134_v63 = vpop.eup %3133  ;;  %3151 = vtanh.f32 %v695_v58  ;;  %1797 = vmatprep.subr.bf16.mxu1 %v2996_v25  ;;  %v3003_v25 = vld [vmem:[#allocation5 + $0x160] ss:$8 sps:$4 sm:$0xff]   ;;  %v3008_v58 = vld [vmem:[#allocation5 + $0x174] ss:$8 sps:$4 sm:$0xff]  }
 0x210   :  { %v3136_v3 = vpop.eup %3135  ;;  %3153 = vtanh.f32 %v719_v55 }
 0x211   :  { %v3138_v4 = vpop.eup %3137  ;;  %v698_v6 = vpop.f32.mrb[48].mxu0  ;;  %v1146_v8 = vpack.c.bf16 %v3136_v3, %v3132_v60  ;;  %3155 = vtanh.f32 %v721_v59 }
 0x212   :  { %v728_v10 = vpop.f32.mrb[8].mxu1  ;;  %v4040_v11 = vpop.eup %3139  ;;  %v699_v12 = vadd.f32 %v698_v6, %v4007_v52  ;;  %v1147_v14 = vpack.c.bf16 %v3138_v4, %v3134_v63  ;;  %3157 = vtanh.f32 %v723_v61  ;;  %1798 = vmatpush1.bf16.msra.mxu1 %v2994_v62 }
 0x213   :  { %v700_v13 = vpop.f32.mrb[49].mxu0  ;;  %v730_v16 = vpop.f32.mrb[9].mxu1  ;;  %3159 = vtanh.f32 %v725_v0  ;;  %1799 = vmatprep.subr.bf16.mxu1 %v2999_v1  ;;  %v729_v28 = vadd.f32 %v728_v10, %v4007_v52 }
 0x214   :  { %v4044_v18 = vpop.eup %3141  ;;  %v701_v19 = vadd.f32 %v700_v13, %v4012_v5  ;;  %v702_v20 = vpop.f32.mrb[50].mxu0  ;;  %3161 = vtanh.f32 %v699_v12  ;;  %1650 = vmatprep.mubr.bf16.mxu1 %v1147_v14  ;;  %v731_v33 = vadd.f32 %v730_v16, %v4012_v5  ;;  %v3006_v12 = vld [vmem:[#allocation5 + $0x170] ss:$8 sps:$4 sm:$0xff]  }
 0x215   :  { %v732_v21 = vpop.f32.mrb[10].mxu1  ;;  %v4048_v23 = vpop.eup %3143  ;;  %v703_v24 = vadd.f32 %v702_v20, %v4007_v52  ;;  %v1158_v30 = vpack.c.bf16 %v4044_v18, %v4034_v57  ;;  %1651 = vmatmul.mubr.bf16.gmra.mrb[52].mxu1 %v1146_v8  ;;  %v3018_v57 = vld [vmem:[#allocation5 + $0x1b0] ss:$8 sps:$4 sm:$0xff]  }
 0x216   :  { %v704_v26 = vpop.f32.mrb[51].mxu0  ;;  %v734_v7 = vpop.f32.mrb[11].mxu1  ;;  %3163 = vtanh.f32 %v701_v19  ;;  %v1159_v34 = vpack.c.bf16 %v4048_v23, %v4040_v11  ;;  %v733_v37 = vadd.f32 %v732_v21, %v4007_v52  ;;  %1800 = vmatpush1.bf16.msra.mxu1 %v2997_v17 }
 0x217   :  { %v705_v32 = vadd.f32 %v704_v26, %v4012_v5  ;;  %v3146_v35 = vpop.eup %3145  ;;  %3165 = vtanh.f32 %v703_v24  ;;  %v735_v40 = vadd.f32 %v734_v7, %v4012_v5  ;;  %1801 = vmatprep.subr.bf16.mxu1 %v3002_v22  ;;  %v3009_v7 = vld [vmem:[#allocation5 + $0x180] ss:$8 sps:$4 sm:$0xff]  }
 0x218   :  { %v3148_v38 = vpop.eup %3147 }
 0x219   :  { %3167 = vtanh.f32 %v705_v32  ;;  %v3150_v42 = vpop.eup %3149  ;;  %v851_v48 = vpop.f32.mrb[52].mxu0 }
 0x21a   :  { %3169 = vtanh.f32 %v729_v28  ;;  %v3152_v51 = vpop.eup %3151  ;;  %v1150_v9 = vpack.c.bf16 %v3150_v42, %v3146_v35  ;;  %v738_v43 = vpop.f32.mrb[12].mxu1  ;;  %v852_v27 = vadd.f32 %v851_v48, %v4059_v36  ;;  %1802 = vmatpush1.bf16.msra.mxu1 %v3000_v29  ;;  %v3014_v29 = vld [vmem:[#allocation5 + $0x194] ss:$8 sps:$4 sm:$0xff]  }
 0x21b   :  { %3171 = vtanh.f32 %v731_v33  ;;  %v4066_v2 = vpop.eup %3153  ;;  %v853_v44 = vpop.f32.mrb[53].mxu0  ;;  %v1151_v45 = vpack.c.bf16 %v3152_v51, %v3148_v38  ;;  %1803 = vmatprep.subr.bf16.mxu1 %v3005_v41  ;;  %v739_v62 = vadd.f32 %v738_v43, %v4007_v52 }
 0x21c   :  { %3173 = vtanh.f32 %v733_v37  ;;  %v740_v49 = vpop.f32.mrb[13].mxu1  ;;  %v4069_v53 = vpop.eup %3155  ;;  %v854_v54 = vadd.f32 %v853_v44, %v4063_v39 }
 0x21d   :  { %v855_v55 = vpop.f32.mrb[54].mxu0  ;;  %3175 = vtanh.f32 %v735_v40  ;;  %v742_v56 = vpop.f32.mrb[14].mxu1  ;;  %1660 = vmatprep.mubr.bf16.mxu1 %v1151_v45  ;;  %v741_v3 = vadd.f32 %v740_v49, %v4012_v5 }
 0x21e   :  { %v4072_v59 = vpop.eup %3157  ;;  %3177 = vtanh.f32 %v852_v27  ;;  %v856_v60 = vadd.f32 %v855_v55, %v4059_v36  ;;  %v857_v61 = vpop.f32.mrb[55].mxu0  ;;  %1661 = vmatmul.mubr.bf16.gmra.mrb[56].mxu1 %v1150_v9  ;;  %v743_v8 = vadd.f32 %v742_v56, %v4007_v52  ;;  %v3017_v56 = vld [vmem:[#allocation5 + $0x1a4] ss:$8 sps:$4 sm:$0xff]  }
 0x21f   :  { %v744_v63 = vpop.f32.mrb[15].mxu1  ;;  %v4076_v0 = vpop.eup %3159  ;;  %3179 = vtanh.f32 %v854_v54  ;;  %v858_v1 = vadd.f32 %v857_v61, %v4063_v39  ;;  %v1162_v4 = vpack.c.bf16 %v4072_v59, %v4066_v2  ;;  %1804 = vmatpush1.bf16.msra.mxu1 %v3003_v25  ;;  %v3012_v25 = vld [vmem:[#allocation5 + $0x190] ss:$8 sps:$4 sm:$0xff]  }
 0x220   :  { %v3162_v6 = vpop.eup %3161  ;;  %3181 = vtanh.f32 %v856_v60  ;;  %v1163_v10 = vpack.c.bf16 %v4076_v0, %v4069_v53  ;;  %v745_v14 = vadd.f32 %v744_v63, %v4012_v5  ;;  %1805 = vmatprep.subr.bf16.mxu1 %v3008_v58  ;;  %v3024_v2 = vld [vmem:[#allocation5 + $0x1d0] ss:$8 sps:$4 sm:$0xff]  }
 0x221   :  { %v3164_v13 = vpop.eup %3163  ;;  %3183 = vtanh.f32 %v858_v1  ;;  %v861_v19 = vpop.f32.mrb[56].mxu0 }
 0x222   :  { %v3166_v16 = vpop.eup %3165  ;;  %3185 = vtanh.f32 %v739_v62  ;;  %v748_v31 = vpop.f32.mrb[16].mxu1  ;;  %v862_v22 = vadd.f32 %v861_v19, %v4059_v36 }
 0x223   :  { %v3168_v17 = vpop.eup %3167  ;;  %v1154_v20 = vpack.c.bf16 %v3166_v16, %v3162_v6  ;;  %3187 = vtanh.f32 %v741_v3  ;;  %v863_v24 = vpop.f32.mrb[57].mxu0  ;;  %1806 = vmatpush1.bf16.msra.mxu1 %v3006_v12  ;;  %v749_v42 = vadd.f32 %v748_v31, %v4007_v52  ;;  %v3015_v3 = vld [vmem:[#allocation5 + $0x1a0] ss:$8 sps:$4 sm:$0xff]  }
 0x224   :  { %v4086_v21 = vpop.eup %3169  ;;  %v1155_v26 = vpack.c.bf16 %v3168_v17, %v3164_v13  ;;  %3189 = vtanh.f32 %v743_v8  ;;  %v750_v28 = vpop.f32.mrb[17].mxu1  ;;  %v864_v33 = vadd.f32 %v863_v24, %v4063_v39  ;;  %1807 = vmatprep.subr.bf16.mxu1 %v3011_v15  ;;  %v3020_v15 = vld [vmem:[#allocation5 + $0x1b4] ss:$8 sps:$4 sm:$0xff]  }
 0x225   :  { %v4089_v32 = vpop.eup %3171  ;;  %v865_v35 = vpop.f32.mrb[58].mxu0  ;;  %3191 = vtanh.f32 %v745_v14  ;;  %v751_v43 = vadd.f32 %v750_v28, %v4012_v5 }
 0x226   :  { %v752_v37 = vpop.f32.mrb[18].mxu1  ;;  %v4092_v38 = vpop.eup %3173  ;;  %3193 = vtanh.f32 %v862_v22  ;;  %v866_v40 = vadd.f32 %v865_v35, %v4059_v36  ;;  %1670 = vmatprep.mubr.bf16.mxu1 %v1155_v26 }
 0x227   :  { %v867_v41 = vpop.f32.mrb[59].mxu0  ;;  %v754_v51 = vpop.f32.mrb[19].mxu1  ;;  %3195 = vtanh.f32 %v864_v33  ;;  %1671 = vmatmul.mubr.bf16.gmra.mrb[60].mxu1 %v1154_v20  ;;  %v1166_v27 = vpack.c.bf16 %v4092_v38, %v4086_v21  ;;  %v753_v45 = vadd.f32 %v752_v37, %v4007_v52  ;;  %v3023_v37 = vld [vmem:[#allocation5 + $0x1c4] ss:$8 sps:$4 sm:$0xff]   ;;  %v3030_v21 = vld [vmem:[#allocation5 + $0x1f0] ss:$8 sps:$4 sm:$0xff]  }
 0x228   :  { %v4096_v48 = vpop.eup %3175  ;;  %v868_v9 = vadd.f32 %v867_v41, %v4063_v39  ;;  %3197 = vtanh.f32 %v866_v40  ;;  %1680 = vmatprep.mubr.bf16.mxu1 %v1159_v34  ;;  %1808 = vmatpush1.bf16.msra.mxu1 %v3009_v7  ;;  %v755_v55 = vadd.f32 %v754_v51, %v4012_v5 }
 0x229   :  { %v4102_v44 = vpop.eup %3177  ;;  %v1167_v49 = vpack.c.bf16 %v4096_v48, %v4089_v32  ;;  %1809 = vmatprep.subr.bf16.mxu1 %v3014_v29  ;;  %v871_v11 = vpop.f32.mrb[60].mxu0 }
 0x22a   :  { %v4110_v54 = vpop.eup %3179  ;;  %3199 = vtanh.f32 %v868_v9  ;;  %v758_v23 = vpop.f32.mrb[20].mxu1  ;;  %v872_v62 = vadd.f32 %v871_v11, %v4059_v36 }
 0x22b   :  { %v4113_v58 = vpop.eup %3181  ;;  %3201 = vtanh.f32 %v749_v42  ;;  %v873_v63 = vpop.f32.mrb[61].mxu0  ;;  %v759_v20 = vadd.f32 %v758_v23, %v4007_v52  ;;  %v3026_v23 = vld [vmem:[#allocation5 + $0x1d4] ss:$8 sps:$4 sm:$0xff]  }
 0x22c   :  { %v4115_v60 = vpop.eup %3183  ;;  %3203 = vtanh.f32 %v751_v43  ;;  %v1140_v34 = vpack.c.bf16 %v4113_v58, %v4102_v44  ;;  %v760_v1 = vpop.f32.mrb[21].mxu1  ;;  %1810 = vmatpush1.bf16.msra.mxu1 %v3012_v25  ;;  %v874_v12 = vadd.f32 %v873_v63, %v4063_v39  ;;  %v3021_v43 = vld [vmem:[#allocation5 + $0x1c0] ss:$8 sps:$4 sm:$0xff]  }
 0x22d   :  { %v4119_v61 = vpop.eup %3185  ;;  %3205 = vtanh.f32 %v753_v45  ;;  %v1141_v6 = vpack.c.bf16 %v4115_v60, %v4110_v54  ;;  %v875_v13 = vpop.f32.mrb[62].mxu0  ;;  %1811 = vmatprep.subr.bf16.mxu1 %v3017_v56  ;;  %v761_v26 = vadd.f32 %v760_v1, %v4012_v5  ;;  %v3041_v54 = vld [vmem:[%s4746_s7 + $0x60] sm:$0xff]   ;;  %v3044_v44 = vld [vmem:[%s4746_s7 + $0x28] sm:$0xff]  }
 0x22e   :  { %v4124_v8 = vpop.eup %3187  ;;  %3207 = vtanh.f32 %v755_v55  ;;  %v762_v14 = vpop.f32.mrb[22].mxu1  ;;  %v876_v17 = vadd.f32 %v875_v13, %v4059_v36 }
 0x22f   :  { %v4127_v16 = vpop.eup %3189  ;;  %3209 = vtanh.f32 %v872_v62  ;;  %v877_v19 = vpop.f32.mrb[63].mxu0  ;;  %1681 = vmatmul.mubr.bf16.gmra.mrb[64].mxu1 %v1158_v30  ;;  %v763_v33 = vadd.f32 %v762_v14, %v4007_v52 }
 0x230   :  { %v764_v31 = vpop.f32.mrb[23].mxu1  ;;  %v4131_v22 = vpop.eup %3191  ;;  %3211 = vtanh.f32 %v874_v12  ;;  %v878_v24 = vadd.f32 %v877_v19, %v4063_v39  ;;  %v1170_v28 = vpack.c.bf16 %v4127_v16, %v4119_v61  ;;  %1690 = vmatprep.mubr.bf16.mxu1 %v1163_v10  ;;  %1812 = vmatpush1.bf16.msra.mxu1 %v3015_v3 }
 0x231   :  { %v4140_v7 = vpop.eup %3193  ;;  %3213 = vtanh.f32 %v876_v17  ;;  %v1171_v35 = vpack.c.bf16 %v4131_v22, %v4124_v8  ;;  %v765_v30 = vadd.f32 %v764_v31, %v4012_v5  ;;  %1813 = vmatprep.subr.bf16.mxu1 %v3020_v15  ;;  %v881_v53 = vpop.f32.mrb[64].mxu0 }
 0x232   :  { %v4148_v18 = vpop.eup %3195  ;;  %3215 = vtanh.f32 %v878_v24  ;;  %v768_v0 = vpop.f32.mrb[24].mxu1  ;;  %v882_v42 = vadd.f32 %v881_v53, %v4059_v36  ;;  %v3029_v24 = vld [vmem:[#allocation5 + $0x1e4] ss:$8 sps:$4 sm:$0xff]  }
 0x233   :  { %v4151_v29 = vpop.eup %3197  ;;  %3217 = vtanh.f32 %v759_v20  ;;  %v883_v51 = vpop.f32.mrb[65].mxu0  ;;  %v769_v3 = vadd.f32 %v768_v0, %v4007_v52  ;;  %v3027_v0 = vld [vmem:[#allocation5 + $0x1e0] ss:$8 sps:$4 sm:$0xff]  }
 0x234   :  { %v4153_v40 = vpop.eup %3199  ;;  %3219 = vtanh.f32 %v761_v26  ;;  %v770_v9 = vpop.f32.mrb[25].mxu1  ;;  %1814 = vmatpush1.bf16.msra.mxu1 %v3018_v57  ;;  %v884_v55 = vadd.f32 %v883_v51, %v4063_v39 }
 0x235   :  { %v4157_v41 = vpop.eup %3201  ;;  %3221 = vtanh.f32 %v763_v33  ;;  %v1145_v45 = vpack.c.bf16 %v4153_v40, %v4148_v18  ;;  %v885_v56 = vpop.f32.mrb[66].mxu0  ;;  %1815 = vmatprep.subr.bf16.mxu1 %v3023_v37  ;;  %v771_v15 = vadd.f32 %v770_v9, %v4012_v5  ;;  %v3045_v18 = vld [vmem:[%s4746_s7 + $0x70] sm:$0xff]  }
 0x236   :  { %v4162_v25 = vpop.eup %3203  ;;  %3223 = vtanh.f32 %v765_v30  ;;  %v772_v11 = vpop.f32.mrb[26].mxu1  ;;  %v886_v63 = vadd.f32 %v885_v56, %v4059_v36  ;;  %v3032_v56 = vld [vmem:[#allocation5 + $0x1f4] ss:$8 sps:$4 sm:$0xff]  }
 0x237   :  { %v4165_v62 = vpop.eup %3205  ;;  %3225 = vtanh.f32 %v882_v42  ;;  %v887_v1 = vpop.f32.mrb[67].mxu0  ;;  %1691 = vmatmul.mubr.bf16.gmra.mrb[68].mxu1 %v1162_v4  ;;  %v773_v20 = vadd.f32 %v772_v11, %v4007_v52 }
 0x238   :  { %v774_v12 = vpop.f32.mrb[27].mxu1  ;;  %v4169_v13 = vpop.eup %3207  ;;  %3227 = vtanh.f32 %v884_v55  ;;  %v888_v14 = vadd.f32 %v887_v1, %v4063_v39  ;;  %v1174_v17 = vpack.c.bf16 %v4165_v62, %v4157_v41  ;;  %1700 = vmatprep.mubr.bf16.mxu1 %v1167_v49  ;;  %1816 = vmatpush1.bf16.msra.mxu1 %v3021_v43 }
 0x239   :  { %v4178_v19 = vpop.eup %3209  ;;  %3229 = vtanh.f32 %v886_v63  ;;  %v1175_v31 = vpack.c.bf16 %v4169_v13, %v4162_v25  ;;  %v775_v4 = vadd.f32 %v774_v12, %v4012_v5  ;;  %1817 = vmatprep.subr.bf16.mxu1 %v3026_v23  ;;  %v891_v32 = vpop.f32.mrb[68].mxu0 }
 0x23a   :  { %v4186_v59 = vpop.eup %3211  ;;  %3231 = vtanh.f32 %v888_v14  ;;  %v778_v48 = vpop.f32.mrb[28].mxu1  ;;  %v892_v30 = vadd.f32 %v891_v32, %v4059_v36 }
 0x23b   :  { %v4189_v26 = vpop.eup %3213  ;;  %3233 = vtanh.f32 %v769_v3  ;;  %v893_v37 = vpop.f32.mrb[69].mxu0  ;;  %v779_v1 = vadd.f32 %v778_v48, %v4007_v52 }
 0x23c   :  { %v4191_v33 = vpop.eup %3215  ;;  %3235 = vtanh.f32 %v771_v15  ;;  %v780_v53 = vpop.f32.mrb[29].mxu1  ;;  %1818 = vmatpush1.bf16.msra.mxu1 %v3024_v2  ;;  %v894_v9 = vadd.f32 %v893_v37, %v4063_v39 }
 0x23d   :  { %v4195_v57 = vpop.eup %3217  ;;  %3237 = vtanh.f32 %v773_v20  ;;  %v895_v43 = vpop.f32.mrb[70].mxu0  ;;  %1819 = vmatprep.subr.bf16.mxu1 %v3029_v24  ;;  %v781_v15 = vadd.f32 %v780_v53, %v4012_v5 }
 0x23e   :  { %v4200_v51 = vpop.eup %3219  ;;  %3239 = vtanh.f32 %v775_v4  ;;  %v782_v55 = vpop.f32.mrb[30].mxu1  ;;  %v896_v23 = vadd.f32 %v895_v43, %v4059_v36 }
 0x23f   :  { %v4203_v11 = vpop.eup %3221  ;;  %3241 = vtanh.f32 %v892_v30  ;;  %v897_v63 = vpop.f32.mrb[71].mxu0  ;;  %1701 = vmatmul.mubr.bf16.gmra.mrb[72].mxu1 %v1166_v27  ;;  %v783_v4 = vadd.f32 %v782_v55, %v4007_v52 }
 0x240   :  { %v784_v3 = vpop.f32.mrb[31].mxu1  ;;  %v4207_v12 = vpop.eup %3223  ;;  %3243 = vtanh.f32 %v894_v9  ;;  %v898_v14 = vadd.f32 %v897_v63, %v4063_v39  ;;  %v1178_v20 = vpack.c.bf16 %v4203_v11, %v4195_v57  ;;  %1710 = vmatprep.mubr.bf16.mxu1 %v1171_v35  ;;  %1820 = vmatpush1.bf16.msra.mxu1 %v3027_v0 }
 0x241   :  { %v4216_v2 = vpop.eup %3225  ;;  %3245 = vtanh.f32 %v896_v23  ;;  %v1179_v24 = vpack.c.bf16 %v4207_v12, %v4200_v51  ;;  %v785_v27 = vadd.f32 %v784_v3, %v4012_v5  ;;  %1821 = vmatprep.subr.bf16.mxu1 %v3032_v56  ;;  %v901_v8 = vpop.f32.mrb[72].mxu0 }
 0x242   :  { %v4224_v38 = vpop.eup %3227  ;;  %3247 = vtanh.f32 %v898_v14  ;;  %v788_v22 = vpop.f32.mrb[32].mxu1  ;;  %v902_v37 = vadd.f32 %v901_v8, %v4059_v36 }
 0x243   :  { %v4227_v32 = vpop.eup %3229  ;;  %3249 = vtanh.f32 %v779_v1  ;;  %v903_v53 = vpop.f32.mrb[73].mxu0  ;;  %v789_v14 = vadd.f32 %v788_v22, %v4007_v52 }
 0x244   :  { %v4229_v48 = vpop.eup %3231  ;;  %3251 = vtanh.f32 %v781_v15  ;;  %v790_v0 = vpop.f32.mrb[33].mxu1  ;;  %1822 = vmatpush1.bf16.msra.mxu1 %v3030_v21  ;;  %v904_v55 = vadd.f32 %v903_v53, %v4063_v39 }
 0x245   :  { %v4233_v30 = vpop.eup %3233  ;;  %3253 = vtanh.f32 %v783_v4  ;;  %v905_v56 = vpop.f32.mrb[74].mxu0 }
 0x246   :  { %v4238_v43 = vpop.eup %3235  ;;  %3255 = vtanh.f32 %v785_v27  ;;  %v792_v23 = vpop.f32.mrb[34].mxu1  ;;  %v906_v1 = vadd.f32 %v905_v56, %v4059_v36  ;;  %v791_v27 = vadd.f32 %v790_v0, %v4012_v5 }
 0x247   :  { %v4241_v63 = vpop.eup %3237  ;;  %3257 = vtanh.f32 %v902_v37  ;;  %v907_v3 = vpop.f32.mrb[75].mxu0  ;;  %1711 = vmatmul.mubr.bf16.gmra.mrb[76].mxu1 %v1170_v28  ;;  %v793_v22 = vadd.f32 %v792_v23, %v4007_v52 }
 0x248   :  { %v794_v15 = vpop.f32.mrb[35].mxu1  ;;  %v4245_v4 = vpop.eup %3239  ;;  %3259 = vtanh.f32 %v904_v55  ;;  %v908_v21 = vadd.f32 %v907_v3, %v4063_v39  ;;  %v1182_v8 = vpack.c.bf16 %v4241_v63, %v4233_v30  ;;  %1720 = vmatprep.mubr.bf16.mxu1 %v1175_v31 }
 0x249   :  { %v4254_v37 = vpop.eup %3241  ;;  %3261 = vtanh.f32 %v906_v1  ;;  %v1183_v53 = vpack.c.bf16 %v4245_v4, %v4238_v43  ;;  %v795_v61 = vadd.f32 %v794_v15, %v4012_v5  ;;  %v911_v0 = vpop.f32.mrb[76].mxu0 }
 0x24a   :  { %v4262_v55 = vpop.eup %3243  ;;  %3263 = vtanh.f32 %v908_v21  ;;  %v798_v56 = vpop.f32.mrb[36].mxu1  ;;  %v912_v31 = vadd.f32 %v911_v0, %v4059_v36 }
 0x24b   :  { %v4265_v16 = vpop.eup %3245  ;;  %3265 = vtanh.f32 %v789_v14  ;;  %v913_v23 = vpop.f32.mrb[77].mxu0  ;;  %v799_v0 = vadd.f32 %v798_v56, %v4007_v52 }
 0x24c   :  { %v4267_v28 = vpop.eup %3247  ;;  %3267 = vtanh.f32 %v791_v27  ;;  %v800_v1 = vpop.f32.mrb[37].mxu1  ;;  %v914_v14 = vadd.f32 %v913_v23, %v4063_v39 }
 0x24d   :  { %v4271_v13 = vpop.eup %3249  ;;  %3269 = vtanh.f32 %v793_v22  ;;  %v915_v21 = vpop.f32.mrb[78].mxu0 }
 0x24e   :  { %v4276_v15 = vpop.eup %3251  ;;  %3271 = vtanh.f32 %v795_v61  ;;  %v802_v27 = vpop.f32.mrb[38].mxu1  ;;  %v916_v47 = vadd.f32 %v915_v21, %v4059_v36  ;;  %v801_v61 = vadd.f32 %v800_v1, %v4012_v5 }
 0x24f   :  { %v4279_v50 = vpop.eup %3253  ;;  %3273 = vtanh.f32 %v912_v31  ;;  %v917_v25 = vpop.f32.mrb[79].mxu0  ;;  %1721 = vmatmul.mubr.bf16.gmra.mrb[80].mxu1 %v1174_v17  ;;  %v803_v56 = vadd.f32 %v802_v27, %v4007_v52 }
 0x250   :  { %v804_v22 = vpop.f32.mrb[39].mxu1  ;;  %v4283_v35 = vpop.eup %3255  ;;  %3275 = vtanh.f32 %v914_v14  ;;  %v918_v3 = vadd.f32 %v917_v25, %v4063_v39  ;;  %v1186_v31 = vpack.c.bf16 %v4279_v50, %v4271_v13  ;;  %1730 = vmatprep.mubr.bf16.mxu1 %v1179_v24 }
 0x251   :  { %v4292_v23 = vpop.eup %3257  ;;  %3277 = vtanh.f32 %v916_v47  ;;  %v1187_v25 = vpack.c.bf16 %v4283_v35, %v4276_v15  ;;  %v805_v41 = vadd.f32 %v804_v22, %v4012_v5  ;;  %v921_v47 = vpop.f32.mrb[80].mxu0 }
 0x252   :  { %v4300_v14 = vpop.eup %3259  ;;  %3279 = vtanh.f32 %v918_v3  ;;  %v808_v1 = vpop.f32.mrb[40].mxu1  ;;  %v922_v24 = vadd.f32 %v921_v47, %v4059_v36 }
 0x253   :  { %v4303_v62 = vpop.eup %3261  ;;  %3281 = vtanh.f32 %v799_v0  ;;  %v923_v21 = vpop.f32.mrb[81].mxu0  ;;  %v809_v47 = vadd.f32 %v808_v1, %v4007_v52 }
 0x254   :  { %v4305_v17 = vpop.eup %3263  ;;  %3283 = vtanh.f32 %v801_v61  ;;  %v810_v3 = vpop.f32.mrb[41].mxu1  ;;  %v924_v0 = vadd.f32 %v923_v21, %v4063_v39 }
 0x255   :  { %v4309_v12 = vpop.eup %3265  ;;  %3285 = vtanh.f32 %v803_v56  ;;  %v925_v9 = vpop.f32.mrb[82].mxu0 }
 0x256   :  { %v4314_v22 = vpop.eup %3267  ;;  %3287 = vtanh.f32 %v805_v41  ;;  %v812_v61 = vpop.f32.mrb[42].mxu1  ;;  %v926_v51 = vadd.f32 %v925_v9, %v4059_v36  ;;  %v811_v41 = vadd.f32 %v810_v3, %v4012_v5 }
 0x257   :  { %v4317_v49 = vpop.eup %3269  ;;  %3289 = vtanh.f32 %v922_v24  ;;  %v927_v42 = vpop.f32.mrb[83].mxu0  ;;  %1731 = vmatmul.mubr.bf16.gmra.mrb[84].mxu1 %v1178_v20  ;;  %v813_v9 = vadd.f32 %v812_v61, %v4007_v52 }
 0x258   :  { %v814_v56 = vpop.f32.mrb[43].mxu1  ;;  %v4321_v10 = vpop.eup %3271  ;;  %3291 = vtanh.f32 %v924_v0  ;;  %v928_v27 = vadd.f32 %v927_v42, %v4063_v39  ;;  %v1190_v24 = vpack.c.bf16 %v4317_v49, %v4309_v12  ;;  %1740 = vmatprep.mubr.bf16.mxu1 %v1183_v53 }
 0x259   :  { %v4330_v21 = vpop.eup %3273  ;;  %3293 = vtanh.f32 %v926_v51  ;;  %v1191_v42 = vpack.c.bf16 %v4321_v10, %v4314_v22  ;;  %v815_v57 = vadd.f32 %v814_v56, %v4012_v5  ;;  %v931_v51 = vpop.f32.mrb[84].mxu0 }
 0x25a   :  { %v4338_v1 = vpop.eup %3275  ;;  %3295 = vtanh.f32 %v928_v27  ;;  %v932_v52 = vadd.f32 %v931_v51, %v4059_v36  ;;  %v933_v10 = vpop.f32.mrb[85].mxu0 }
 0x25b   :  { %v4341_v11 = vpop.eup %3277  ;;  %3297 = vtanh.f32 %v809_v47  ;;  %v934_v3 = vadd.f32 %v933_v10, %v4063_v39  ;;  %v935_v27 = vpop.f32.mrb[86].mxu0 }
 0x25c   :  { %v4343_v20 = vpop.eup %3279  ;;  %3299 = vtanh.f32 %v811_v41  ;;  %v936_v0 = vadd.f32 %v935_v27, %v4059_v36  ;;  %v937_v61 = vpop.f32.mrb[87].mxu0 }
 0x25d   :  { %v4347_v4 = vpop.eup %3281  ;;  %3301 = vtanh.f32 %v813_v9  ;;  %v938_v56 = vadd.f32 %v937_v61, %v4063_v39 }
 0x25e   :  { %v4352_v5 = vpop.eup %3283  ;;  %3303 = vtanh.f32 %v815_v57 }
 0x25f   :  { %v4355_v22 = vpop.eup %3285  ;;  %3305 = vtanh.f32 %v932_v52  ;;  %1741 = vmatmul.mubr.bf16.gmra.mrb[88].mxu1 %v1182_v8 }
 0x260   :  { %v3288_v47 = vpop.eup %3287  ;;  %3307 = vtanh.f32 %v934_v3  ;;  %v1194_v41 = vpack.c.bf16 %v4355_v22, %v4347_v4  ;;  %1750 = vmatprep.mubr.bf16.mxu1 %v1187_v25 }
 0x261   :  { %v4364_v9 = vpop.eup %3289  ;;  %3309 = vtanh.f32 %v936_v0  ;;  %v1195_v57 = vpack.c.bf16 %v3288_v47, %v4352_v5  ;;  %v941_v30 = vpop.f32.mrb[88].mxu0 }
 0x262   :  { %v4370_v51 = vpop.eup %3291  ;;  %3311 = vtanh.f32 %v938_v56  ;;  %v942_v3 = vadd.f32 %v941_v30, %v4059_v36  ;;  %v943_v27 = vpop.f32.mrb[89].mxu0 }
 0x263   :  { %v4372_v52 = vpop.eup %3293  ;;  %v944_v25 = vadd.f32 %v943_v27, %v4063_v39  ;;  %v945_v5 = vpop.f32.mrb[90].mxu0 }
 0x264   :  { %v4374_v10 = vpop.eup %3295  ;;  %3313 = vtanh.f32 %v942_v3  ;;  %v946_v61 = vadd.f32 %v945_v5, %v4059_v36  ;;  %v947_v47 = vpop.f32.mrb[91].mxu0  ;;  %v3033_v3 = vld [vmem:[%s4746_s7 + $0x40] sm:$0xff]  }
 0x265   :  { %v4378_v8 = vpop.eup %3297  ;;  %3315 = vtanh.f32 %v944_v25  ;;  %v948_v63 = vadd.f32 %v947_v47, %v4063_v39  ;;  %v3034_v25 = vld [vmem:[%s4746_s7] sm:$0xff]   ;;  %2580 = vmatprep.subr.bf16.mxu0 %v3033_v3 }
 0x266   :  { %v3300_v15 = vpop.eup %3299  ;;  %3317 = vtanh.f32 %v946_v61  ;;  %2581 = vmatpush3.bf16.msra.mxu0 %v3034_v25 }
 0x267   :  { %v4384_v0 = vpop.eup %3301  ;;  %1751 = vmatmul.mubr.bf16.gmra.mrb[92].mxu1 %v1186_v31  ;;  %3319 = vtanh.f32 %v948_v63 }
 0x268   :  { %v3304_v56 = vpop.eup %3303  ;;  %v1198_v30 = vpack.c.bf16 %v4384_v0, %v4378_v8  ;;  %1760 = vmatprep.mubr.bf16.mxu1 %v1191_v42 }
 0x269   :  { %v4393_v35 = vpop.eup %3305  ;;  %v1199_v27 = vpack.c.bf16 %v3304_v56, %v3300_v15  ;;  %v951_v31 = vpop.f32.mrb[92].mxu0 }
 0x26a   :  { %v4401_v5 = vpop.eup %3307  ;;  %v952_v15 = vadd.f32 %v951_v31, %v4059_v36  ;;  %v953_v61 = vpop.f32.mrb[93].mxu0 }
 0x26b   :  { %v4403_v50 = vpop.eup %3309  ;;  %v954_v56 = vadd.f32 %v953_v61, %v4063_v39  ;;  %v955_v43 = vpop.f32.mrb[94].mxu0 }
 0x26c   :  { %v4405_v13 = vpop.eup %3311  ;;  %3321 = vtanh.f32 %v952_v15  ;;  %v956_v63 = vadd.f32 %v955_v43, %v4059_v36  ;;  %v957_v3 = vpop.f32.mrb[95].mxu0 }
 0x26d   :  { %3323 = vtanh.f32 %v954_v56  ;;  %v958_v53 = vadd.f32 %v957_v3, %v4063_v39 }
 0x26e   :  { %v4418_v25 = vpop.eup %3313  ;;  %3325 = vtanh.f32 %v956_v63 }
 0x26f   :  { %1761 = vmatmul.mubr.bf16.gmra.mrb[96].mxu1 %v1190_v24  ;;  %v4420_v31 = vpop.eup %3315  ;;  %3327 = vtanh.f32 %v958_v53 }
 0x270   :  { %1770 = vmatprep.mubr.bf16.mxu1 %v1195_v57  ;;  %v4422_v61 = vpop.eup %3317 }
 0x271   :  { %v4424_v15 = vpop.eup %3319  ;;  %v961_v43 = vpop.f32.mrb[96].mxu0 }
 0x272   :  { %v962_v3 = vadd.f32 %v961_v43, %v4059_v36  ;;  %v963_v42 = vpop.f32.mrb[97].mxu0  ;;  %v3036_v43 = vld [vmem:[%s4746_s7 + $0x8] sm:$0xff]  }
 0x273   :  { %v964_v12 = vadd.f32 %v963_v42, %v4063_v39  ;;  %v965_v24 = vpop.f32.mrb[98].mxu0  ;;  %v3035_v42 = vld [vmem:[%s4746_s7 + $0x48] sm:$0xff]  }
 0x274   :  { %3329 = vtanh.f32 %v962_v3  ;;  %v966_v53 = vadd.f32 %v965_v24, %v4059_v36  ;;  %v967_v57 = vpop.f32.mrb[99].mxu0  ;;  %2582 = vmatprep.subr.bf16.mxu0 %v3035_v42 }
 0x275   :  { %3331 = vtanh.f32 %v964_v12  ;;  %v968_v63 = vadd.f32 %v967_v57, %v4063_v39  ;;  %2583 = vmatpush3.bf16.msra.mxu0 %v3036_v43  ;;  %v3037_v43 = vld [vmem:[%s4746_s7 + $0x50] sm:$0xff]  }
 0x276   :  { %v4437_v56 = vpop.eup %3321  ;;  %3333 = vtanh.f32 %v966_v53  ;;  %2584 = vmatprep.subr.bf16.mxu0 %v3037_v43 }
 0x277   :  { %1771 = vmatmul.mubr.bf16.gmra.mrb[100].mxu1 %v1194_v41  ;;  %v4445_v3 = vpop.eup %3323  ;;  %3335 = vtanh.f32 %v968_v63 }
 0x278   :  { %1780 = vmatprep.mubr.bf16.mxu1 %v1199_v27  ;;  %v4447_v12 = vpop.eup %3325 }
 0x279   :  { %v4449_v4 = vpop.eup %3327  ;;  %v971_v22 = vpop.f32.mrb[100].mxu0 }
 0x27a   :  { %v972_v27 = vadd.f32 %v971_v22, %v4059_v36  ;;  %v973_v24 = vpop.f32.mrb[101].mxu0  ;;  %v3038_v22 = vld [vmem:[%s4746_s7 + $0x10] sm:$0xff]  }
 0x27b   :  { %v974_v57 = vadd.f32 %v973_v24, %v4063_v39  ;;  %v975_v49 = vpop.f32.mrb[102].mxu0  ;;  %2585 = vmatpush3.bf16.msra.mxu0 %v3038_v22 }
 0x27c   :  { %3337 = vtanh.f32 %v972_v27  ;;  %v976_v63 = vadd.f32 %v975_v49, %v4059_v36  ;;  %v977_v42 = vpop.f32.mrb[103].mxu0  ;;  %v3039_v49 = vld [vmem:[%s4746_s7 + $0x58] sm:$0xff]  }
 0x27d   :  { %3339 = vtanh.f32 %v974_v57  ;;  %v978_v47 = vadd.f32 %v977_v42, %v4063_v39  ;;  %2586 = vmatprep.subr.bf16.mxu0 %v3039_v49  ;;  %v3042_v49 = vld [vmem:[%s4746_s7 + $0x20] sm:$0xff]  }
 0x27e   :  { %v4471_v27 = vpop.eup %3329  ;;  %3341 = vtanh.f32 %v976_v63 }
 0x27f   :  { %1781 = vmatmul.mubr.bf16.gmra.mrb[104].mxu1 %v1198_v30  ;;  %v4476_v8 = vpop.eup %3331  ;;  %3343 = vtanh.f32 %v978_v47  ;;  %v3040_v30 = vld [vmem:[%s4746_s7 + $0x18] sm:$0xff]  }
 0x280   :  { %1823 = vmatprep.mubr.bf16.mxu1 %v1141_v6  ;;  %v4478_v0 = vpop.eup %3333  ;;  %2587 = vmatpush3.bf16.msra.mxu0 %v3040_v30 }
 0x281   :  { %v4483_v24 = vpop.eup %3335  ;;  %v981_v57 = vpop.f32.mrb[104].mxu0  ;;  %2588 = vmatprep.subr.bf16.mxu0 %v3041_v54 }
 0x282   :  { %v982_v60 = vadd.f32 %v981_v57, %v4059_v36  ;;  %v983_v6 = vpop.f32.mrb[105].mxu0  ;;  %v3043_v57 = vld [vmem:[%s4746_s7 + $0x68] sm:$0xff]  }
 0x283   :  { %v984_v42 = vadd.f32 %v983_v6, %v4063_v39  ;;  %v985_v43 = vpop.f32.mrb[106].mxu0 }
 0x284   :  { %3345 = vtanh.f32 %v982_v60  ;;  %v986_v22 = vadd.f32 %v985_v43, %v4059_v36  ;;  %v987_v41 = vpop.f32.mrb[107].mxu0  ;;  %2589 = vmatpush3.bf16.msra.mxu0 %v3042_v49  ;;  %v3046_v49 = vld [vmem:[%s4746_s7 + $0x30] sm:$0xff]  }
 0x285   :  { %3347 = vtanh.f32 %v984_v42  ;;  %v988_v63 = vadd.f32 %v987_v41, %v4063_v39  ;;  %2590 = vmatprep.subr.bf16.mxu0 %v3043_v57 }
 0x286   :  { %v4505_v60 = vpop.eup %3337  ;;  %3349 = vtanh.f32 %v986_v22 }
 0x287   :  { %1824 = vmatmul.mubr.bf16.vlgmr.msra.gmra.mrb[44].mxu1 %v1140_v34  ;;  %v4510_v30 = vpop.eup %3339  ;;  %3351 = vtanh.f32 %v988_v63 }
 0x288   :  { %1833 = vmatprep.mubr.bf16.mxu1 %v1145_v45  ;;  %v4512_v41 = vpop.eup %3341  ;;  %2591 = vmatpush3.bf16.msra.mxu0 %v3044_v44 }
 0x289   :  { %v4517_v58 = vpop.eup %3343  ;;  %v991_v34 = vpop.f32.mrb[108].mxu0  ;;  %2592 = vmatprep.subr.bf16.mxu0 %v3045_v18 }
 0x28a   :  { %v992_v40 = vadd.f32 %v991_v34, %v4059_v36  ;;  %v993_v45 = vpop.f32.mrb[109].mxu0  ;;  %v4751_v34 = vpack.c.bf16 %v4151_v29, %v4140_v7 }
 0x28b   :  { %v994_v6 = vadd.f32 %v993_v45, %v4063_v39  ;;  %v995_v42 = vpop.f32.mrb[110].mxu0 }
 0x28c   :  { %3353 = vtanh.f32 %v992_v40  ;;  %v996_v43 = vadd.f32 %v995_v42, %v4059_v36  ;;  %v997_v22 = vpop.f32.mrb[111].mxu0  ;;  %v4752_v40 = vpack.c.bf16 %v4191_v33, %v4186_v59  ;;  %2593 = vmatpush3.bf16.msra.mxu0 %v3046_v49  ;;  %v4753_v33 = vpack.c.bf16 %v4189_v26, %v4178_v19 }
 0x28d   :  { %3355 = vtanh.f32 %v994_v6  ;;  %v998_v57 = vadd.f32 %v997_v22, %v4063_v39  ;;  %v4756_v19 = vpack.c.bf16 %v4267_v28, %v4262_v55  ;;  %v4761_v55 = vpack.c.bf16 %v4341_v11, %v4330_v21 }
 0x28e   :  { %v3346_v54 = vpop.eup %3345  ;;  %3357 = vtanh.f32 %v996_v43  ;;  %v4764_v28 = vpack.c.bf16 %v4405_v13, %v4401_v5  ;;  %v4769_v21 = vpack.c.bf16 %v4447_v12, %v4437_v56  ;;  %v4771_v11 = vpack.c.bf16 %v4478_v0, %v4471_v27 }
 0x28f   :  { %1834 = vmatmul.mubr.bf16.gmra.mrb[48].mxu1 %v4751_v34  ;;  %v3348_v45 = vpop.eup %3347  ;;  %3359 = vtanh.f32 %v998_v57 }
 0x290   :  { %1843 = vmatprep.mubr.bf16.mxu1 %v4752_v40  ;;  %v3350_v44 = vpop.eup %3349  ;;  %v4755_v40 = vpack.c.bf16 %v4227_v32, %v4216_v2  ;;  %v4759_v2 = vpack.c.bf16 %v4303_v62, %v4292_v23  ;;  %v4760_v32 = vpack.c.bf16 %v4343_v20, %v4338_v1  ;;  %v4765_v23 = vpack.c.bf16 %v4403_v50, %v4393_v35 }
 0x291   :  { %v3352_v42 = vpop.eup %3351  ;;  %v1001_v63 = vpop.f32.mrb[112].mxu0  ;;  %v1192_v6 = vpack.c.bf16 %v3350_v44, %v3346_v54  ;;  %v4754_v54 = vpack.c.bf16 %v4229_v48, %v4224_v38  ;;  %v4767_v62 = vpack.c.bf16 %v4422_v61, %v4418_v25  ;;  %v4770_v1 = vpack.c.bf16 %v4483_v24, %v4476_v8 }
 0x292   :  { %v1002_v22 = vadd.f32 %v1001_v63, %v4059_v36  ;;  %v1003_v47 = vpop.f32.mrb[113].mxu0  ;;  %v1193_v53 = vpack.c.bf16 %v3352_v42, %v3348_v45  ;;  %v4757_v42 = vpack.c.bf16 %v4265_v16, %v4254_v37  ;;  %v4762_v37 = vpack.c.bf16 %v4374_v10, %v4370_v51  ;;  %v3048_v51 = vld [vmem:[%s4746_s7 + $0x38] sm:$0xff]   ;;  %v1266_v10 = vld [vmem:[%s4745_s6] sm:$0x3] }
 0x293   :  { %v1004_v7 = vadd.f32 %v1003_v47, %v4063_v39  ;;  %v1005_v29 = vpop.f32.mrb[114].mxu0  ;;  %v4763_v16 = vpack.c.bf16 %v4372_v52, %v4364_v9  ;;  %v4772_v20 = vpack.c.bf16 %v4517_v58, %v4510_v30  ;;  %v3047_v9 = vld [vmem:[%s4746_s7 + $0x78] sm:$0xff]   ;;  %v4773_v52 = vpack.c.bf16 %v4512_v41, %v4505_v60 }
 0x294   :  { %3361 = vtanh.f32 %v1002_v22  ;;  %v1006_v18 = vadd.f32 %v1005_v29, %v4059_v36  ;;  %v1007_v43 = vpop.f32.mrb[115].mxu0  ;;  %v4758_v22 = vpack.c.bf16 %v4305_v17, %v4300_v14  ;;  %v4766_v14 = vpack.c.bf16 %v4424_v15, %v4420_v31  ;;  %2594 = vmatprep.subr.bf16.mxu0 %v3047_v9 }
 0x295   :  { %3363 = vtanh.f32 %v1004_v7  ;;  %v1008_v59 = vadd.f32 %v1007_v43, %v4063_v39  ;;  %v4768_v17 = vpack.c.bf16 %v4449_v4, %v4445_v3  ;;  %2595 = vmatpush3.bf16.msra.mxu0 %v3048_v51  ;;  %v4774_v35 = vsub.s32 0, %v3995_v46 }
 0x296   :  { %v3354_v49 = vpop.eup %3353  ;;  %3365 = vtanh.f32 %v1006_v18  ;;  %v4775_v50 = vsub.s32 1, %v3995_v46 }
 0x297   :  { %1844 = vmatmul.mubr.bf16.gmra.mrb[52].mxu1 %v4753_v33  ;;  %v3356_v63 = vpop.eup %3355  ;;  %3367 = vtanh.f32 %v1008_v59  ;;  %v4617_v5 = vrot.slane %v1266_v10, %v4774_v35 }
 0x298   :  { %1853 = vmatprep.mubr.bf16.mxu1 %v4754_v54  ;;  %v3358_v47 = vpop.eup %3357  ;;  %v4621_v13 = vrot.slane %v1266_v10, %v4775_v50 }
 0x299   :  { %v3360_v57 = vpop.eup %3359  ;;  %v1196_v34 = vpack.c.bf16 %v3358_v47, %v3354_v49 }
 0x29a   :  { %v1197_v36 = vpack.c.bf16 %v3360_v57, %v3356_v63 }
 0x29e   :  { %v3362_v39 = vpop.eup %3361 }
 0x29f   :  { %1854 = vmatmul.mubr.bf16.gmra.mrb[56].mxu1 %v4755_v40  ;;  %v3364_v26 = vpop.eup %3363 }
 0x2a0   :  { %1863 = vmatprep.mubr.bf16.mxu1 %v4756_v19  ;;  %v3366_v45 = vpop.eup %3365 }
 0x2a1   :  { %v3368_v44 = vpop.eup %3367  ;;  %v1200_v38 = vpack.c.bf16 %v3366_v45, %v3362_v39 }
 0x2a2   :  { %v1201_v48 = vpack.c.bf16 %v3368_v44, %v3364_v26 }
 0x2a7   :  { %1864 = vmatmul.mubr.bf16.gmra.mrb[60].mxu1 %v4757_v42 }
 0x2a8   :  { %1873 = vmatprep.mubr.bf16.mxu1 %v4758_v22 }
 0x2af   :  { %1874 = vmatmul.mubr.bf16.gmra.mrb[64].mxu1 %v4759_v2 }
 0x2b0   :  { %1883 = vmatprep.mubr.bf16.mxu1 %v4760_v32 }
 0x2b7   :  { %1884 = vmatmul.mubr.bf16.gmra.mrb[68].mxu1 %v4761_v55 }
 0x2b8   :  { %1893 = vmatprep.mubr.bf16.mxu1 %v4762_v37 }
 0x2bf   :  { %1894 = vmatmul.mubr.bf16.gmra.mrb[72].mxu1 %v4763_v16 }
 0x2c0   :  { %1903 = vmatprep.mubr.bf16.mxu1 %v4764_v28 }
 0x2c7   :  { %1904 = vmatmul.mubr.bf16.gmra.mrb[76].mxu1 %v4765_v23 }
 0x2c8   :  { %1913 = vmatprep.mubr.bf16.mxu1 %v4766_v14 }
 0x2cf   :  { %1914 = vmatmul.mubr.bf16.gmra.mrb[80].mxu1 %v4767_v62 }
 0x2d0   :  { %1923 = vmatprep.mubr.bf16.mxu1 %v4768_v17 }
 0x2d7   :  { %1924 = vmatmul.mubr.bf16.gmra.mrb[84].mxu1 %v4769_v21 }
 0x2d8   :  { %1933 = vmatprep.mubr.bf16.mxu1 %v4770_v1 }
 0x2df   :  { %1934 = vmatmul.mubr.bf16.gmra.mrb[88].mxu1 %v4771_v11 }
 0x2e0   :  { %1943 = vmatprep.mubr.bf16.mxu1 %v4772_v20 }
 0x2e7   :  { %1944 = vmatmul.mubr.bf16.gmra.mrb[92].mxu1 %v4773_v52 }
 0x2e8   :  { %1953 = vmatprep.mubr.bf16.mxu1 %v1193_v53 }
 0x2ef   :  { %1954 = vmatmul.mubr.bf16.gmra.mrb[96].mxu1 %v1192_v6 }
 0x2f0   :  { %1963 = vmatprep.mubr.bf16.mxu1 %v1197_v36 }
 0x2f7   :  { %1964 = vmatmul.mubr.bf16.gmra.mrb[100].mxu1 %v1196_v34 }
 0x2f8   :  { %1973 = vmatprep.mubr.bf16.mxu1 %v1201_v48 }
 0x2ff   :  { %1974 = vmatmul.mubr.bf16.gmra.mrb[104].mxu1 %v1200_v38 }
 0x35a   :  { %v1825_v25 = vpop.f32.mrb[44].mxu1 }
 0x35b   :  { %v2748_v31 = vadd.f32 %v1825_v25, %v4617_v5  ;;  %v1827_v61 = vpop.f32.mrb[45].mxu1 }
 0x35c   :  { %v2749_v15 = vadd.f32 %v1827_v61, %v4621_v13  ;;  %v1829_v56 = vpop.f32.mrb[46].mxu1 }
 0x35d   :  { %3369 = vtanh.f32 %v2748_v31  ;;  %v2750_v3 = vadd.f32 %v1829_v56, %v4617_v5  ;;  %v1831_v12 = vpop.f32.mrb[47].mxu1 }
 0x35e   :  { %3371 = vtanh.f32 %v2749_v15  ;;  %v2751_v4 = vadd.f32 %v1831_v12, %v4621_v13 }
 0x35f   :  { %3373 = vtanh.f32 %v2750_v3 }
 0x360   :  { %3375 = vtanh.f32 %v2751_v4 }
 0x362   :  { %v1835_v53 = vpop.f32.mrb[48].mxu1 }
 0x363   :  { %v2752_v46 = vadd.f32 %v1835_v53, %v4617_v5  ;;  %v1837_v27 = vpop.f32.mrb[49].mxu1 }
 0x364   :  { %v2753_v8 = vadd.f32 %v1837_v27, %v4621_v13  ;;  %v1839_v0 = vpop.f32.mrb[50].mxu1 }
 0x365   :  { %3377 = vtanh.f32 %v2752_v46  ;;  %v2754_v24 = vadd.f32 %v1839_v0, %v4617_v5  ;;  %v1841_v60 = vpop.f32.mrb[51].mxu1 }
 0x366   :  { %3379 = vtanh.f32 %v2753_v8  ;;  %v2755_v30 = vadd.f32 %v1841_v60, %v4621_v13 }
 0x367   :  { %v3370_v41 = vpop.eup %3369  ;;  %3381 = vtanh.f32 %v2754_v24 }
 0x368   :  { %v3372_v58 = vpop.eup %3371  ;;  %3383 = vtanh.f32 %v2755_v30 }
 0x369   :  { %v3374_v6 = vpop.eup %3373 }
 0x36a   :  { %v3376_v7 = vpop.eup %3375  ;;  %v1845_v29 = vpop.f32.mrb[52].mxu1  ;;  %v2048_v18 = vpack.c.bf16 %v3374_v6, %v3370_v41 }
 0x36b   :  { %v2756_v43 = vadd.f32 %v1845_v29, %v4617_v5  ;;  %v1847_v59 = vpop.f32.mrb[53].mxu1  ;;  %v2049_v33 = vpack.c.bf16 %v3376_v7, %v3372_v58 }
 0x36c   :  { %v2757_v49 = vadd.f32 %v1847_v59, %v4621_v13  ;;  %v1849_v54 = vpop.f32.mrb[54].mxu1 }
 0x36d   :  { %3385 = vtanh.f32 %v2756_v43  ;;  %v2758_v63 = vadd.f32 %v1849_v54, %v4617_v5  ;;  %v1851_v47 = vpop.f32.mrb[55].mxu1  ;;  %2247 = vmatprep.mubr.bf16.mxu0 %v2049_v33 }
 0x36e   :  { %3387 = vtanh.f32 %v2757_v49  ;;  %v2759_v57 = vadd.f32 %v1851_v47, %v4621_v13  ;;  %2248 = vmatmul.mubr.bf16.vlgmr.msra.gmra.mrb[116].mxu0 %v2048_v18 }
 0x36f   :  { %v3378_v34 = vpop.eup %3377  ;;  %3389 = vtanh.f32 %v2758_v63 }
 0x370   :  { %v3380_v36 = vpop.eup %3379  ;;  %3391 = vtanh.f32 %v2759_v57 }
 0x371   :  { %v3382_v40 = vpop.eup %3381 }
 0x372   :  { %v3384_v39 = vpop.eup %3383  ;;  %v1855_v19 = vpop.f32.mrb[56].mxu1  ;;  %v2050_v26 = vpack.c.bf16 %v3382_v40, %v3378_v34 }
 0x373   :  { %v2760_v45 = vadd.f32 %v1855_v19, %v4617_v5  ;;  %v1857_v44 = vpop.f32.mrb[57].mxu1  ;;  %v2051_v38 = vpack.c.bf16 %v3384_v39, %v3380_v36 }
 0x374   :  { %v2761_v48 = vadd.f32 %v1857_v44, %v4621_v13  ;;  %v1859_v42 = vpop.f32.mrb[58].mxu1 }
 0x375   :  { %3393 = vtanh.f32 %v2760_v45  ;;  %v2762_v22 = vadd.f32 %v1859_v42, %v4617_v5  ;;  %v1861_v2 = vpop.f32.mrb[59].mxu1  ;;  %2255 = vmatprep.mubr.bf16.mxu0 %v2051_v38 }
 0x376   :  { %3395 = vtanh.f32 %v2761_v48  ;;  %v2763_v32 = vadd.f32 %v1861_v2, %v4621_v13  ;;  %2256 = vmatmul.mubr.bf16.gmra.mrb[120].mxu0 %v2050_v26 }
 0x377   :  { %v3386_v55 = vpop.eup %3385  ;;  %3397 = vtanh.f32 %v2762_v22 }
 0x378   :  { %v3388_v37 = vpop.eup %3387  ;;  %3399 = vtanh.f32 %v2763_v32 }
 0x379   :  { %v3390_v16 = vpop.eup %3389 }
 0x37a   :  { %v3392_v28 = vpop.eup %3391  ;;  %v1865_v23 = vpop.f32.mrb[60].mxu1  ;;  %v2052_v14 = vpack.c.bf16 %v3390_v16, %v3386_v55 }
 0x37b   :  { %v2764_v62 = vadd.f32 %v1865_v23, %v4617_v5  ;;  %v1867_v17 = vpop.f32.mrb[61].mxu1  ;;  %v2053_v21 = vpack.c.bf16 %v3392_v28, %v3388_v37 }
 0x37c   :  { %v2765_v1 = vadd.f32 %v1867_v17, %v4621_v13  ;;  %v1869_v11 = vpop.f32.mrb[62].mxu1 }
 0x37d   :  { %3401 = vtanh.f32 %v2764_v62  ;;  %v2766_v20 = vadd.f32 %v1869_v11, %v4617_v5  ;;  %v1871_v9 = vpop.f32.mrb[63].mxu1  ;;  %2263 = vmatprep.mubr.bf16.mxu0 %v2053_v21 }
 0x37e   :  { %3403 = vtanh.f32 %v2765_v1  ;;  %v2767_v51 = vadd.f32 %v1871_v9, %v4621_v13  ;;  %2264 = vmatmul.mubr.bf16.gmra.mrb[124].mxu0 %v2052_v14 }
 0x37f   :  { %v3394_v52 = vpop.eup %3393  ;;  %3405 = vtanh.f32 %v2766_v20 }
 0x380   :  { %v3396_v10 = vpop.eup %3395  ;;  %3407 = vtanh.f32 %v2767_v51 }
 0x381   :  { %v3398_v35 = vpop.eup %3397 }
 0x382   :  { %v3400_v50 = vpop.eup %3399  ;;  %v1875_v25 = vpop.f32.mrb[64].mxu1  ;;  %v2054_v31 = vpack.c.bf16 %v3398_v35, %v3394_v52 }
 0x383   :  { %v2768_v61 = vadd.f32 %v1875_v25, %v4617_v5  ;;  %v1877_v15 = vpop.f32.mrb[65].mxu1  ;;  %v2055_v56 = vpack.c.bf16 %v3400_v50, %v3396_v10 }
 0x384   :  { %v2769_v3 = vadd.f32 %v1877_v15, %v4621_v13  ;;  %v1879_v12 = vpop.f32.mrb[66].mxu1 }
 0x385   :  { %3409 = vtanh.f32 %v2768_v61  ;;  %v2770_v4 = vadd.f32 %v1879_v12, %v4617_v5  ;;  %v1881_v53 = vpop.f32.mrb[67].mxu1  ;;  %2271 = vmatprep.mubr.bf16.mxu0 %v2055_v56 }
 0x386   :  { %3411 = vtanh.f32 %v2769_v3  ;;  %v2771_v46 = vadd.f32 %v1881_v53, %v4621_v13  ;;  %2272 = vmatmul.mubr.bf16.gmra.mrb[128].mxu0 %v2054_v31 }
 0x387   :  { %v3402_v27 = vpop.eup %3401  ;;  %3413 = vtanh.f32 %v2770_v4 }
 0x388   :  { %v3404_v8 = vpop.eup %3403  ;;  %3415 = vtanh.f32 %v2771_v46 }
 0x389   :  { %v3406_v0 = vpop.eup %3405 }
 0x38a   :  { %v3408_v24 = vpop.eup %3407  ;;  %v1885_v60 = vpop.f32.mrb[68].mxu1  ;;  %v2056_v30 = vpack.c.bf16 %v3406_v0, %v3402_v27 }
 0x38b   :  { %v2772_v41 = vadd.f32 %v1885_v60, %v4617_v5  ;;  %v1887_v58 = vpop.f32.mrb[69].mxu1  ;;  %v2057_v6 = vpack.c.bf16 %v3408_v24, %v3404_v8 }
 0x38c   :  { %v2773_v7 = vadd.f32 %v1887_v58, %v4621_v13  ;;  %v1889_v29 = vpop.f32.mrb[70].mxu1 }
 0x38d   :  { %3417 = vtanh.f32 %v2772_v41  ;;  %v2774_v18 = vadd.f32 %v1889_v29, %v4617_v5  ;;  %v1891_v43 = vpop.f32.mrb[71].mxu1  ;;  %2279 = vmatprep.mubr.bf16.mxu0 %v2057_v6 }
 0x38e   :  { %3419 = vtanh.f32 %v2773_v7  ;;  %v2775_v59 = vadd.f32 %v1891_v43, %v4621_v13  ;;  %2280 = vmatmul.mubr.bf16.gmra.mrb[132].mxu0 %v2056_v30 }
 0x38f   :  { %v3410_v33 = vpop.eup %3409  ;;  %3421 = vtanh.f32 %v2774_v18 }
 0x390   :  { %v3412_v49 = vpop.eup %3411  ;;  %3423 = vtanh.f32 %v2775_v59 }
 0x391   :  { %v3414_v54 = vpop.eup %3413 }
 0x392   :  { %v3416_v63 = vpop.eup %3415  ;;  %v1895_v47 = vpop.f32.mrb[72].mxu1  ;;  %v2058_v57 = vpack.c.bf16 %v3414_v54, %v3410_v33 }
 0x393   :  { %v2776_v34 = vadd.f32 %v1895_v47, %v4617_v5  ;;  %v1897_v36 = vpop.f32.mrb[73].mxu1  ;;  %v2059_v40 = vpack.c.bf16 %v3416_v63, %v3412_v49 }
 0x394   :  { %v2777_v39 = vadd.f32 %v1897_v36, %v4621_v13  ;;  %v1899_v19 = vpop.f32.mrb[74].mxu1 }
 0x395   :  { %3425 = vtanh.f32 %v2776_v34  ;;  %v2778_v26 = vadd.f32 %v1899_v19, %v4617_v5  ;;  %v1901_v45 = vpop.f32.mrb[75].mxu1  ;;  %2287 = vmatprep.mubr.bf16.mxu0 %v2059_v40 }
 0x396   :  { %3427 = vtanh.f32 %v2777_v39  ;;  %v2779_v44 = vadd.f32 %v1901_v45, %v4621_v13  ;;  %2288 = vmatmul.mubr.bf16.gmra.mrb[136].mxu0 %v2058_v57 }
 0x397   :  { %v3418_v38 = vpop.eup %3417  ;;  %3429 = vtanh.f32 %v2778_v26 }
 0x398   :  { %v3420_v48 = vpop.eup %3419  ;;  %3431 = vtanh.f32 %v2779_v44 }
 0x399   :  { %v3422_v42 = vpop.eup %3421 }
 0x39a   :  { %v3424_v22 = vpop.eup %3423  ;;  %v1905_v2 = vpop.f32.mrb[76].mxu1  ;;  %v2060_v32 = vpack.c.bf16 %v3422_v42, %v3418_v38 }
 0x39b   :  { %v2780_v55 = vadd.f32 %v1905_v2, %v4617_v5  ;;  %v1907_v37 = vpop.f32.mrb[77].mxu1  ;;  %v2061_v16 = vpack.c.bf16 %v3424_v22, %v3420_v48 }
 0x39c   :  { %v2781_v28 = vadd.f32 %v1907_v37, %v4621_v13  ;;  %v1909_v23 = vpop.f32.mrb[78].mxu1 }
 0x39d   :  { %3433 = vtanh.f32 %v2780_v55  ;;  %v2782_v14 = vadd.f32 %v1909_v23, %v4617_v5  ;;  %v1911_v62 = vpop.f32.mrb[79].mxu1  ;;  %2295 = vmatprep.mubr.bf16.mxu0 %v2061_v16 }
 0x39e   :  { %3435 = vtanh.f32 %v2781_v28  ;;  %v2783_v17 = vadd.f32 %v1911_v62, %v4621_v13  ;;  %2296 = vmatmul.mubr.bf16.gmra.mrb[140].mxu0 %v2060_v32 }
 0x39f   :  { %v3426_v21 = vpop.eup %3425  ;;  %3437 = vtanh.f32 %v2782_v14 }
 0x3a0   :  { %v3428_v1 = vpop.eup %3427  ;;  %3439 = vtanh.f32 %v2783_v17 }
 0x3a1   :  { %v3430_v11 = vpop.eup %3429 }
 0x3a2   :  { %v3432_v20 = vpop.eup %3431  ;;  %v1915_v9 = vpop.f32.mrb[80].mxu1  ;;  %v2062_v51 = vpack.c.bf16 %v3430_v11, %v3426_v21 }
 0x3a3   :  { %v2784_v52 = vadd.f32 %v1915_v9, %v4617_v5  ;;  %v1917_v10 = vpop.f32.mrb[81].mxu1  ;;  %v2063_v35 = vpack.c.bf16 %v3432_v20, %v3428_v1 }
 0x3a4   :  { %v2785_v50 = vadd.f32 %v1917_v10, %v4621_v13  ;;  %v1919_v25 = vpop.f32.mrb[82].mxu1 }
 0x3a5   :  { %3441 = vtanh.f32 %v2784_v52  ;;  %v2786_v31 = vadd.f32 %v1919_v25, %v4617_v5  ;;  %v1921_v61 = vpop.f32.mrb[83].mxu1  ;;  %2303 = vmatprep.mubr.bf16.mxu0 %v2063_v35 }
 0x3a6   :  { %3443 = vtanh.f32 %v2785_v50  ;;  %v2787_v15 = vadd.f32 %v1921_v61, %v4621_v13  ;;  %2304 = vmatmul.mubr.bf16.gmra.mrb[144].mxu0 %v2062_v51 }
 0x3a7   :  { %v3434_v56 = vpop.eup %3433  ;;  %3445 = vtanh.f32 %v2786_v31 }
 0x3a8   :  { %v3436_v3 = vpop.eup %3435  ;;  %3447 = vtanh.f32 %v2787_v15 }
 0x3a9   :  { %v3438_v12 = vpop.eup %3437 }
 0x3aa   :  { %v3440_v4 = vpop.eup %3439  ;;  %v1925_v53 = vpop.f32.mrb[84].mxu1  ;;  %v2064_v46 = vpack.c.bf16 %v3438_v12, %v3434_v56 }
 0x3ab   :  { %v2788_v27 = vadd.f32 %v1925_v53, %v4617_v5  ;;  %v1927_v8 = vpop.f32.mrb[85].mxu1  ;;  %v2065_v0 = vpack.c.bf16 %v3440_v4, %v3436_v3 }
 0x3ac   :  { %v2789_v24 = vadd.f32 %v1927_v8, %v4621_v13  ;;  %v1929_v60 = vpop.f32.mrb[86].mxu1 }
 0x3ad   :  { %3449 = vtanh.f32 %v2788_v27  ;;  %v2790_v30 = vadd.f32 %v1929_v60, %v4617_v5  ;;  %v1931_v41 = vpop.f32.mrb[87].mxu1  ;;  %2311 = vmatprep.mubr.bf16.mxu0 %v2065_v0 }
 0x3ae   :  { %3451 = vtanh.f32 %v2789_v24  ;;  %v2791_v58 = vadd.f32 %v1931_v41, %v4621_v13  ;;  %2312 = vmatmul.mubr.bf16.gmra.mrb[148].mxu0 %v2064_v46 }
 0x3af   :  { %v3442_v6 = vpop.eup %3441  ;;  %3453 = vtanh.f32 %v2790_v30 }
 0x3b0   :  { %v3444_v7 = vpop.eup %3443  ;;  %3455 = vtanh.f32 %v2791_v58 }
 0x3b1   :  { %v3446_v29 = vpop.eup %3445 }
 0x3b2   :  { %v3448_v18 = vpop.eup %3447  ;;  %v1935_v43 = vpop.f32.mrb[88].mxu1  ;;  %v2066_v59 = vpack.c.bf16 %v3446_v29, %v3442_v6 }
 0x3b3   :  { %v2792_v33 = vadd.f32 %v1935_v43, %v4617_v5  ;;  %v1937_v49 = vpop.f32.mrb[89].mxu1  ;;  %v2067_v54 = vpack.c.bf16 %v3448_v18, %v3444_v7 }
 0x3b4   :  { %v2793_v63 = vadd.f32 %v1937_v49, %v4621_v13  ;;  %v1939_v47 = vpop.f32.mrb[90].mxu1 }
 0x3b5   :  { %3457 = vtanh.f32 %v2792_v33  ;;  %v2794_v57 = vadd.f32 %v1939_v47, %v4617_v5  ;;  %v1941_v34 = vpop.f32.mrb[91].mxu1  ;;  %2319 = vmatprep.mubr.bf16.mxu0 %v2067_v54 }
 0x3b6   :  { %3459 = vtanh.f32 %v2793_v63  ;;  %v2795_v36 = vadd.f32 %v1941_v34, %v4621_v13  ;;  %2320 = vmatmul.mubr.bf16.gmra.mrb[152].mxu0 %v2066_v59 }
 0x3b7   :  { %v3450_v40 = vpop.eup %3449  ;;  %3461 = vtanh.f32 %v2794_v57 }
 0x3b8   :  { %v3452_v39 = vpop.eup %3451  ;;  %3463 = vtanh.f32 %v2795_v36 }
 0x3b9   :  { %v3454_v19 = vpop.eup %3453 }
 0x3ba   :  { %v3456_v26 = vpop.eup %3455  ;;  %v1945_v45 = vpop.f32.mrb[92].mxu1  ;;  %v2068_v44 = vpack.c.bf16 %v3454_v19, %v3450_v40 }
 0x3bb   :  { %v2796_v38 = vadd.f32 %v1945_v45, %v4617_v5  ;;  %v1947_v48 = vpop.f32.mrb[93].mxu1  ;;  %v2069_v42 = vpack.c.bf16 %v3456_v26, %v3452_v39 }
 0x3bc   :  { %v2797_v22 = vadd.f32 %v1947_v48, %v4621_v13  ;;  %v1949_v2 = vpop.f32.mrb[94].mxu1 }
 0x3bd   :  { %3465 = vtanh.f32 %v2796_v38  ;;  %v2798_v32 = vadd.f32 %v1949_v2, %v4617_v5  ;;  %v1951_v55 = vpop.f32.mrb[95].mxu1  ;;  %2327 = vmatprep.mubr.bf16.mxu0 %v2069_v42 }
 0x3be   :  { %3467 = vtanh.f32 %v2797_v22  ;;  %v2799_v37 = vadd.f32 %v1951_v55, %v4621_v13  ;;  %2328 = vmatmul.mubr.bf16.gmra.mrb[156].mxu0 %v2068_v44  ;;  %v4690_v44 = vld [vmem:[%s4747_s8] ss:$0 sm:$0xff]  ;;  %s3576_s8 = smov [#allocation7]  }
 0x3bf   :  { %v3458_v16 = vpop.eup %3457  ;;  %3469 = vtanh.f32 %v2798_v32  ;;  %s2413_s23 = sshll.u32 %s3576_s8, 4  ;;  %s2414_s23 = int_to_ptr.vmem [resolvable:$true] %s2413_s23 }
 0x3c0   :  { %v3460_v28 = vpop.eup %3459  ;;  %3471 = vtanh.f32 %v2799_v37  ;;  %s3541_s24 = scalar_lea.vmem %s2414_s23, 4096  ;;  %p3546_p3 = scmp.lt.s32.totalorder %s2414_s23, %s2414_s23 }
 0x3c1   :  { %v3462_v23 = vpop.eup %3461  ;;  %p3542_p2 = scmp.ne.s32.totalorder %s2414_s23, %s3541_s24  ;;  %p3547_p4 = scmp.lt.s32.totalorder %s3541_s24, %s3541_s24 }
 0x3c2   :  { %v3464_v14 = vpop.eup %3463  ;;  %v1955_v62 = vpop.f32.mrb[96].mxu1  ;;  %v2070_v17 = vpack.c.bf16 %v3462_v23, %v3458_v16 }
 0x3c3   :  { %v2800_v21 = vadd.f32 %v1955_v62, %v4617_v5  ;;  %v1957_v1 = vpop.f32.mrb[97].mxu1  ;;  %v2071_v11 = vpack.c.bf16 %v3464_v14, %v3460_v28  ;;  %p3548_p5 = por %p3547_p4, %p3546_p3 }
 0x3c4   :  { %v2801_v20 = vadd.f32 %v1957_v1, %v4621_v13  ;;  %v1959_v9 = vpop.f32.mrb[98].mxu1 }
 0x3c5   :  { %3473 = vtanh.f32 %v2800_v21  ;;  %v2802_v51 = vadd.f32 %v1959_v9, %v4617_v5  ;;  %v1961_v52 = vpop.f32.mrb[99].mxu1  ;;  %2335 = vmatprep.mubr.bf16.mxu0 %v2071_v11  ;;  %p3549_p6 = pnand %p3548_p5, %p3542_p2 }
 0x3c6   :  { %3475 = vtanh.f32 %v2801_v20  ;;  %v2803_v10 = vadd.f32 %v1961_v52, %v4621_v13  ;;  %2336 = vmatmul.mubr.bf16.gmra.mrb[160].mxu0 %v2070_v17 }
 0x3c7   :  { %v3466_v35 = vpop.eup %3465  ;;  %3477 = vtanh.f32 %v2802_v51 }
 0x3c8   :  { %v3468_v50 = vpop.eup %3467  ;;  %3479 = vtanh.f32 %v2803_v10 }
 0x3c9   :  { %v3470_v25 = vpop.eup %3469 }
 0x3ca   :  { %v3472_v31 = vpop.eup %3471  ;;  %v1965_v61 = vpop.f32.mrb[100].mxu1  ;;  %v2072_v15 = vpack.c.bf16 %v3470_v25, %v3466_v35 }
 0x3cb   :  { %v2804_v56 = vadd.f32 %v1965_v61, %v4617_v5  ;;  %v1967_v3 = vpop.f32.mrb[101].mxu1  ;;  %v2073_v12 = vpack.c.bf16 %v3472_v31, %v3468_v50 }
 0x3cc   :  { %v2805_v4 = vadd.f32 %v1967_v3, %v4621_v13  ;;  %v1969_v53 = vpop.f32.mrb[102].mxu1 }
 0x3cd   :  { %3481 = vtanh.f32 %v2804_v56  ;;  %v2806_v46 = vadd.f32 %v1969_v53, %v4617_v5  ;;  %v1971_v27 = vpop.f32.mrb[103].mxu1  ;;  %2343 = vmatprep.mubr.bf16.mxu0 %v2073_v12 }
 0x3ce   :  { %3483 = vtanh.f32 %v2805_v4  ;;  %v2807_v8 = vadd.f32 %v1971_v27, %v4621_v13  ;;  %2344 = vmatmul.mubr.bf16.gmra.mrb[164].mxu0 %v2072_v15 }
 0x3cf   :  { %v3474_v0 = vpop.eup %3473  ;;  %3485 = vtanh.f32 %v2806_v46 }
 0x3d0   :  { %v3476_v24 = vpop.eup %3475  ;;  %3487 = vtanh.f32 %v2807_v8 }
 0x3d1   :  { %v3478_v60 = vpop.eup %3477 }
 0x3d2   :  { %v3480_v30 = vpop.eup %3479  ;;  %v1975_v41 = vpop.f32.mrb[104].mxu1  ;;  %v2074_v58 = vpack.c.bf16 %v3478_v60, %v3474_v0 }
 0x3d3   :  { %v2808_v6 = vadd.f32 %v1975_v41, %v4617_v5  ;;  %v1977_v7 = vpop.f32.mrb[105].mxu1  ;;  %v2075_v29 = vpack.c.bf16 %v3480_v30, %v3476_v24 }
 0x3d4   :  { %v2809_v18 = vadd.f32 %v1977_v7, %v4621_v13  ;;  %v1979_v43 = vpop.f32.mrb[106].mxu1 }
 0x3d5   :  { %3489 = vtanh.f32 %v2808_v6  ;;  %v2810_v59 = vadd.f32 %v1979_v43, %v4617_v5  ;;  %v1981_v33 = vpop.f32.mrb[107].mxu1  ;;  %2351 = vmatprep.mubr.bf16.mxu0 %v2075_v29 }
 0x3d6   :  { %3491 = vtanh.f32 %v2809_v18  ;;  %v2811_v49 = vadd.f32 %v1981_v33, %v4621_v13  ;;  %2352 = vmatmul.mubr.bf16.gmra.mrb[168].mxu0 %v2074_v58 }
 0x3d7   :  { %v3482_v54 = vpop.eup %3481  ;;  %3493 = vtanh.f32 %v2810_v59 }
 0x3d8   :  { %v3484_v63 = vpop.eup %3483  ;;  %3495 = vtanh.f32 %v2811_v49 }
 0x3d9   :  { %v3486_v47 = vpop.eup %3485 }
 0x3da   :  { %v3488_v57 = vpop.eup %3487  ;;  %v2076_v34 = vpack.c.bf16 %v3486_v47, %v3482_v54 }
 0x3db   :  { %v2077_v36 = vpack.c.bf16 %v3488_v57, %v3484_v63 }
 0x3dd   :  { %2359 = vmatprep.mubr.bf16.mxu0 %v2077_v36 }
 0x3de   :  { %2360 = vmatmul.mubr.bf16.gmra.mrb[172].mxu0 %v2076_v34 }
 0x3df   :  { %v3490_v40 = vpop.eup %3489 }
 0x3e0   :  { %v3492_v39 = vpop.eup %3491 }
 0x3e1   :  { %v3494_v19 = vpop.eup %3493 }
 0x3e2   :  { %v3496_v5 = vpop.eup %3495  ;;  %v2078_v26 = vpack.c.bf16 %v3494_v19, %v3490_v40 }
 0x3e3   :  { %v2079_v45 = vpack.c.bf16 %v3496_v5, %v3492_v39 }
 0x3e5   :  { %2367 = vmatprep.mubr.bf16.mxu0 %v2079_v45 }
 0x3e6   :  { %2368 = vmatmul.mubr.bf16.gmra.mrb[176].mxu0 %v2078_v26 }
 0x441   :  { %v2596_v13 = vpop.f32.mrb[116].mxu0 }
 0x442   :  { %v2597_v38 = vpop.f32.mrb[117].mxu0 }
 0x443   :  { %v2598_v48 = vadd.f32 %v2597_v38, %v2596_v13  ;;  %v2599_v42 = vpop.f32.mrb[118].mxu0 }
 0x444   :  { %v2600_v22 = vpop.f32.mrb[119].mxu0 }
 0x445   :  { %v2250_v2 = vadd.f32 %v2598_v48, %v4690_v44  ;;  %v2601_v32 = vadd.f32 %v2600_v22, %v2599_v42 }
 0x447   :  { %2376 = vst [vmem:[#allocation7] sm:$0xff] %v2250_v2  ;;  %v2253_v55 = vadd.f32 %v2601_v32, %v4690_v44 }
 0x449   :  { %2377 = vst [vmem:[#allocation7 + $0x8] sm:$0xff] %v2253_v55  ;;  %v2602_v37 = vpop.f32.mrb[120].mxu0 }
 0x44a   :  { %v2603_v16 = vpop.f32.mrb[121].mxu0 }
 0x44b   :  { %v2604_v28 = vadd.f32 %v2603_v16, %v2602_v37  ;;  %v2605_v23 = vpop.f32.mrb[122].mxu0 }
 0x44c   :  { %v2606_v14 = vpop.f32.mrb[123].mxu0 }
 0x44d   :  { %v2258_v62 = vadd.f32 %v2604_v28, %v4690_v44  ;;  %v2607_v17 = vadd.f32 %v2606_v14, %v2605_v23 }
 0x44f   :  { %2378 = vst [vmem:[#allocation7 + $0x10] sm:$0xff] %v2258_v62  ;;  %v2261_v21 = vadd.f32 %v2607_v17, %v4690_v44 }
 0x451   :  { %2379 = vst [vmem:[#allocation7 + $0x18] sm:$0xff] %v2261_v21  ;;  %v2608_v1 = vpop.f32.mrb[124].mxu0 }
 0x452   :  { %v2609_v11 = vpop.f32.mrb[125].mxu0 }
 0x453   :  { %v2610_v20 = vadd.f32 %v2609_v11, %v2608_v1  ;;  %v2611_v9 = vpop.f32.mrb[126].mxu0 }
 0x454   :  { %v2612_v51 = vpop.f32.mrb[127].mxu0 }
 0x455   :  { %v2266_v52 = vadd.f32 %v2610_v20, %v4690_v44  ;;  %v2613_v10 = vadd.f32 %v2612_v51, %v2611_v9 }
 0x457   :  { %2380 = vst [vmem:[#allocation7 + $0x20] sm:$0xff] %v2266_v52  ;;  %v2269_v35 = vadd.f32 %v2613_v10, %v4690_v44 }
 0x459   :  { %2381 = vst [vmem:[#allocation7 + $0x28] sm:$0xff] %v2269_v35  ;;  %v2614_v50 = vpop.f32.mrb[128].mxu0 }
 0x45a   :  { %v2615_v25 = vpop.f32.mrb[129].mxu0 }
 0x45b   :  { %v2616_v31 = vadd.f32 %v2615_v25, %v2614_v50  ;;  %v2617_v61 = vpop.f32.mrb[130].mxu0 }
 0x45c   :  { %v2618_v15 = vpop.f32.mrb[131].mxu0 }
 0x45d   :  { %v2274_v56 = vadd.f32 %v2616_v31, %v4690_v44  ;;  %v2619_v3 = vadd.f32 %v2618_v15, %v2617_v61 }
 0x45f   :  { %2382 = vst [vmem:[#allocation7 + $0x30] sm:$0xff] %v2274_v56  ;;  %v2277_v12 = vadd.f32 %v2619_v3, %v4690_v44 }
 0x461   :  { %2383 = vst [vmem:[#allocation7 + $0x38] sm:$0xff] %v2277_v12  ;;  %v2620_v4 = vpop.f32.mrb[132].mxu0 }
 0x462   :  { %v2621_v53 = vpop.f32.mrb[133].mxu0 }
 0x463   :  { %v2622_v46 = vadd.f32 %v2621_v53, %v2620_v4  ;;  %v2623_v27 = vpop.f32.mrb[134].mxu0 }
 0x464   :  { %v2624_v8 = vpop.f32.mrb[135].mxu0 }
 0x465   :  { %v2282_v0 = vadd.f32 %v2622_v46, %v4690_v44  ;;  %v2625_v24 = vadd.f32 %v2624_v8, %v2623_v27 }
 0x467   :  { %2384 = vst [vmem:[#allocation7 + $0x40] sm:$0xff] %v2282_v0  ;;  %v2285_v60 = vadd.f32 %v2625_v24, %v4690_v44 }
 0x469   :  { %2385 = vst [vmem:[#allocation7 + $0x48] sm:$0xff] %v2285_v60  ;;  %v2626_v30 = vpop.f32.mrb[136].mxu0 }
 0x46a   :  { %v2627_v41 = vpop.f32.mrb[137].mxu0 }
 0x46b   :  { %v2628_v58 = vadd.f32 %v2627_v41, %v2626_v30  ;;  %v2629_v6 = vpop.f32.mrb[138].mxu0 }
 0x46c   :  { %v2630_v7 = vpop.f32.mrb[139].mxu0 }
 0x46d   :  { %v2290_v29 = vadd.f32 %v2628_v58, %v4690_v44  ;;  %v2631_v18 = vadd.f32 %v2630_v7, %v2629_v6 }
 0x46f   :  { %2386 = vst [vmem:[#allocation7 + $0x50] sm:$0xff] %v2290_v29  ;;  %v2293_v43 = vadd.f32 %v2631_v18, %v4690_v44 }
 0x471   :  { %2387 = vst [vmem:[#allocation7 + $0x58] sm:$0xff] %v2293_v43  ;;  %v2632_v59 = vpop.f32.mrb[140].mxu0 }
 0x472   :  { %v2633_v33 = vpop.f32.mrb[141].mxu0 }
 0x473   :  { %v2634_v49 = vadd.f32 %v2633_v33, %v2632_v59  ;;  %v2635_v54 = vpop.f32.mrb[142].mxu0 }
 0x474   :  { %v2636_v63 = vpop.f32.mrb[143].mxu0 }
 0x475   :  { %v2298_v47 = vadd.f32 %v2634_v49, %v4690_v44  ;;  %v2637_v57 = vadd.f32 %v2636_v63, %v2635_v54 }
 0x477   :  { %2388 = vst [vmem:[#allocation7 + $0x60] sm:$0xff] %v2298_v47  ;;  %v2301_v34 = vadd.f32 %v2637_v57, %v4690_v44 }
 0x479   :  { %2389 = vst [vmem:[#allocation7 + $0x68] sm:$0xff] %v2301_v34  ;;  %v2638_v36 = vpop.f32.mrb[144].mxu0 }
 0x47a   :  { %v2639_v40 = vpop.f32.mrb[145].mxu0 }
 0x47b   :  { %v2640_v39 = vadd.f32 %v2639_v40, %v2638_v36  ;;  %v2641_v19 = vpop.f32.mrb[146].mxu0 }
 0x47c   :  { %v2642_v5 = vpop.f32.mrb[147].mxu0 }
 0x47d   :  { %v2306_v26 = vadd.f32 %v2640_v39, %v4690_v44  ;;  %v2643_v45 = vadd.f32 %v2642_v5, %v2641_v19 }
 0x47f   :  { %2390 = vst [vmem:[#allocation7 + $0x70] sm:$0xff] %v2306_v26  ;;  %v2309_v13 = vadd.f32 %v2643_v45, %v4690_v44 }
 0x481   :  { %2391 = vst [vmem:[#allocation7 + $0x78] sm:$0xff] %v2309_v13  ;;  %v2644_v38 = vpop.f32.mrb[148].mxu0 }
 0x482   :  { %v2645_v48 = vpop.f32.mrb[149].mxu0 }
 0x483   :  { %v2646_v42 = vadd.f32 %v2645_v48, %v2644_v38  ;;  %v2647_v22 = vpop.f32.mrb[150].mxu0 }
 0x484   :  { %v2648_v2 = vpop.f32.mrb[151].mxu0 }
 0x485   :  { %v2314_v32 = vadd.f32 %v2646_v42, %v4690_v44  ;;  %v2649_v55 = vadd.f32 %v2648_v2, %v2647_v22 }
 0x487   :  { %2392 = vst [vmem:[#allocation7 + $0x80] sm:$0xff] %v2314_v32  ;;  %v2317_v37 = vadd.f32 %v2649_v55, %v4690_v44 }
 0x489   :  { %2393 = vst [vmem:[#allocation7 + $0x88] sm:$0xff] %v2317_v37  ;;  %v2650_v16 = vpop.f32.mrb[152].mxu0 }
 0x48a   :  { %v2651_v28 = vpop.f32.mrb[153].mxu0 }
 0x48b   :  { %v2652_v23 = vadd.f32 %v2651_v28, %v2650_v16  ;;  %v2653_v14 = vpop.f32.mrb[154].mxu0 }
 0x48c   :  { %v2654_v62 = vpop.f32.mrb[155].mxu0 }
 0x48d   :  { %v2322_v17 = vadd.f32 %v2652_v23, %v4690_v44  ;;  %v2655_v21 = vadd.f32 %v2654_v62, %v2653_v14 }
 0x48f   :  { %2394 = vst [vmem:[#allocation7 + $0x90] sm:$0xff] %v2322_v17  ;;  %v2325_v1 = vadd.f32 %v2655_v21, %v4690_v44 }
 0x491   :  { %2395 = vst [vmem:[#allocation7 + $0x98] sm:$0xff] %v2325_v1  ;;  %v2656_v11 = vpop.f32.mrb[156].mxu0 }
 0x492   :  { %v2657_v20 = vpop.f32.mrb[157].mxu0 }
 0x493   :  { %v2658_v9 = vadd.f32 %v2657_v20, %v2656_v11  ;;  %v2659_v51 = vpop.f32.mrb[158].mxu0 }
 0x494   :  { %v2660_v52 = vpop.f32.mrb[159].mxu0 }
 0x495   :  { %v2330_v10 = vadd.f32 %v2658_v9, %v4690_v44  ;;  %v2661_v35 = vadd.f32 %v2660_v52, %v2659_v51 }
 0x497   :  { %2396 = vst [vmem:[#allocation7 + $0xa0] sm:$0xff] %v2330_v10  ;;  %v2333_v50 = vadd.f32 %v2661_v35, %v4690_v44 }
 0x499   :  { %2397 = vst [vmem:[#allocation7 + $0xa8] sm:$0xff] %v2333_v50  ;;  %v2662_v25 = vpop.f32.mrb[160].mxu0 }
 0x49a   :  { %v2663_v31 = vpop.f32.mrb[161].mxu0 }
 0x49b   :  { %v2664_v61 = vadd.f32 %v2663_v31, %v2662_v25  ;;  %v2665_v15 = vpop.f32.mrb[162].mxu0 }
 0x49c   :  { %v2666_v56 = vpop.f32.mrb[163].mxu0 }
 0x49d   :  { %v2338_v3 = vadd.f32 %v2664_v61, %v4690_v44  ;;  %v2667_v12 = vadd.f32 %v2666_v56, %v2665_v15 }
 0x49f   :  { %2398 = vst [vmem:[#allocation7 + $0xb0] sm:$0xff] %v2338_v3  ;;  %v2341_v4 = vadd.f32 %v2667_v12, %v4690_v44 }
 0x4a1   :  { %2399 = vst [vmem:[#allocation7 + $0xb8] sm:$0xff] %v2341_v4  ;;  %v2668_v53 = vpop.f32.mrb[164].mxu0 }
 0x4a2   :  { %v2669_v46 = vpop.f32.mrb[165].mxu0 }
 0x4a3   :  { %v2670_v27 = vadd.f32 %v2669_v46, %v2668_v53  ;;  %v2671_v8 = vpop.f32.mrb[166].mxu0 }
 0x4a4   :  { %v2672_v0 = vpop.f32.mrb[167].mxu0 }
 0x4a5   :  { %v2346_v24 = vadd.f32 %v2670_v27, %v4690_v44  ;;  %v2673_v60 = vadd.f32 %v2672_v0, %v2671_v8 }
 0x4a7   :  { %2400 = vst [vmem:[#allocation7 + $0xc0] sm:$0xff] %v2346_v24  ;;  %v2349_v30 = vadd.f32 %v2673_v60, %v4690_v44 }
 0x4a9   :  { %2401 = vst [vmem:[#allocation7 + $0xc8] sm:$0xff] %v2349_v30  ;;  %v2674_v41 = vpop.f32.mrb[168].mxu0 }
 0x4aa   :  { %v2675_v58 = vpop.f32.mrb[169].mxu0 }
 0x4ab   :  { %v2676_v6 = vadd.f32 %v2675_v58, %v2674_v41  ;;  %v2677_v7 = vpop.f32.mrb[170].mxu0 }
 0x4ac   :  { %v2678_v29 = vpop.f32.mrb[171].mxu0 }
 0x4ad   :  { %v2354_v18 = vadd.f32 %v2676_v6, %v4690_v44  ;;  %v2679_v43 = vadd.f32 %v2678_v29, %v2677_v7 }
 0x4af   :  { %2402 = vst [vmem:[#allocation7 + $0xd0] sm:$0xff] %v2354_v18  ;;  %v2357_v59 = vadd.f32 %v2679_v43, %v4690_v44 }
 0x4b1   :  { %2403 = vst [vmem:[#allocation7 + $0xd8] sm:$0xff] %v2357_v59  ;;  %v2680_v33 = vpop.f32.mrb[172].mxu0 }
 0x4b2   :  { %v2681_v49 = vpop.f32.mrb[173].mxu0 }
 0x4b3   :  { %v2682_v54 = vadd.f32 %v2681_v49, %v2680_v33  ;;  %v2683_v63 = vpop.f32.mrb[174].mxu0 }
 0x4b4   :  { %v2684_v47 = vpop.f32.mrb[175].mxu0 }
 0x4b5   :  { %v2362_v57 = vadd.f32 %v2682_v54, %v4690_v44  ;;  %v2685_v34 = vadd.f32 %v2684_v47, %v2683_v63 }
 0x4b7   :  { %2404 = vst [vmem:[#allocation7 + $0xe0] sm:$0xff] %v2362_v57  ;;  %v2365_v36 = vadd.f32 %v2685_v34, %v4690_v44 }
 0x4b9   :  { %2405 = vst [vmem:[#allocation7 + $0xe8] sm:$0xff] %v2365_v36  ;;  %v2686_v40 = vpop.f32.mrb[176].mxu0 }
 0x4ba   :  { %v2687_v39 = vpop.f32.mrb[177].mxu0 }
 0x4bb   :  { %v2688_v19 = vadd.f32 %v2687_v39, %v2686_v40  ;;  %v2689_v5 = vpop.f32.mrb[178].mxu0 }
 0x4bc   :  { %v2690_v26 = vpop.f32.mrb[179].mxu0 }
 0x4bd   :  { %v2370_v45 = vadd.f32 %v2688_v19, %v4690_v44  ;;  %v2691_v13 = vadd.f32 %v2690_v26, %v2689_v5 }
 0x4bf   :  { %2406 = vst [vmem:[#allocation7 + $0xf0] sm:$0xff] %v2370_v45  ;;  %v2373_v38 = vadd.f32 %v2691_v13, %v4690_v44 }
 0x4c1   :  { %2407 = vst [vmem:[#allocation7 + $0xf8] sm:$0xff] %v2373_v38 }
 0x4c2   :  { %3552 = shalt.err (!%p3549_p6)
}
 0x4c3   :  { %s3553_s26 = scalar_lea.hbm %s4748_s9, 4096 }
 0x4c4   :  { %p3554_p7 = scmp.ne.s32.totalorder %s4748_s9, %s3553_s26  ;;  %p3557_p8 = scmp.lt.u32.totalorder %s3553_s26, %s4748_s9 }
 0x4c6   :  { %p3559_p9 = pnand %p3557_p8, %p3554_p7 }
 0x4c8   :  { %3562 = shalt.err (!%p3559_p9)
}
 0x4c9   :  { %2419 = dma.vmem_to_hbm [thread:$0]  %s2414_s23, 4096, %s4748_s9, [#allocation4], %s3573_s1, %s3573_s1, %s3574_s10  }
 0x4ca   :  { %3567 = dma.done.wait [#allocation4], 4096  }
 0x4cb   :  { %3568 = vsyncadd [#allocation4], 4294963200 }
 0x4cc   :  { %2423 = vsyncpa [#allocation3], 1 }
 0x4cd   :  { %2424 = vsyncpa [#allocation6], 1 }
 0x4ce   :  { %2425 = vsyncpa [#allocation4], 1 }

</bundles_post_ra>
